<compile_context>
chip_gen: v7x
topology: tpu7x:2x2x1
jax: 0.10.0
libtpu: 0.0.40
codegen_flags: <defaults>
</compile_context>

<pallas_src>
import functools

import jax
import jax.numpy as jnp
from jax.experimental import pallas as pl
from jax.experimental.pallas import tpu as pltpu


# -----------------------------------------------------------------------------
# Pallas kernel: full Attention forward for one batch element (all P patches).
# -----------------------------------------------------------------------------
def _attention_kernel(x_ref,      # (1, P*n, dim)
                      wqkv_ref,   # (dim, 3*inner)  pre-transposed, q cols pre-scaled
                      wout_ref,   # (inner, dim)    pre-transposed (unused if not project_out)
                      bout_ref,   # (1, dim)        (unused if not project_out)
                      out_ref,    # (1, P*n, dim)
                      *, patches: int, pixels: int, heads: int, dim_head: int,
                      project_out: bool):
    inner = heads * dim_head
    M = patches * pixels

    # ---- qkv projection: one (P*n, dim) x (dim, 3*inner) matmul on the MXU ----
    qkv = jnp.dot(x_ref[0], wqkv_ref[...],
                  preferred_element_type=jnp.float32)            # (P*n, 3*inner)

    # The module uses plain row-major reshapes (b,p,n,h*d) -> (b,p,h,n,d): a
    # memory reinterpretation, NOT a head transpose.  jnp.reshape has identical
    # row-major semantics, so we reproduce it exactly.
    q = qkv[:, :inner].reshape(patches * heads, pixels, dim_head)
    k = qkv[:, inner:2 * inner].reshape(patches * heads, pixels, dim_head)
    v = qkv[:, 2 * inner:].reshape(patches * heads, pixels, dim_head)

    # ---- scaled dot-product attention (scale already folded into q weights) ----
    dots = jnp.einsum('bnd,bmd->bnm', q, k,
                      preferred_element_type=jnp.float32)        # (P*h, n, n)
    dots = dots - jnp.max(dots, axis=-1, keepdims=True)
    e = jnp.exp(dots)                                            # EUP
    attn = e / jnp.sum(e, axis=-1, keepdims=True)
    o = jnp.einsum('bnm,bmd->bnd', attn, v,
                   preferred_element_type=jnp.float32)           # (P*h, n, d)

    # Inverse row-major reinterpretation: (p,h,n,d) -> (p*n, h*d).
    o2 = o.reshape(M, inner)

    # ---- output projection (+ bias); Dropout is identity at inference ----
    if project_out:
        y = jnp.dot(o2, wout_ref[...], preferred_element_type=jnp.float32)
        y = y + bout_ref[...]
    else:
        y = o2            # to_out == nn.Identity()  (only when inner == dim)
    out_ref[0] = y


# -----------------------------------------------------------------------------
# Wrapper: weight prep (transpose + scale folding) and pallas_call setup.
# -----------------------------------------------------------------------------
def attention_forward(x, w_qkv, w_out, b_out, *, heads, dim_head):
    B, P, n, dim = x.shape
    inner = heads * dim_head
    scale = dim_head ** (-0.5)
    project_out = not (heads == 1 and dim_head == dim)

    # Pre-transpose weights to (in, out) once, host-side; fold the softmax
    # scale into the q columns of the qkv weight.
    wqkv_t = jnp.transpose(w_qkv).astype(jnp.float32)            # (dim, 3*inner)
    wqkv_t = wqkv_t.at[:, :inner].multiply(scale)

    if project_out:
        wout_t = jnp.transpose(w_out).astype(jnp.float32)        # (inner, dim)
        bout2 = b_out.reshape(1, dim).astype(jnp.float32)
    else:
        wout_t = jnp.zeros((inner, dim), jnp.float32)            # unused in-kernel
        bout2 = jnp.zeros((1, dim), jnp.float32)                 # unused in-kernel

    # Free contiguous reshape in the wrapper; kernel sees lane-dense row slabs.
    x3 = x.reshape(B, P * n, dim).astype(jnp.float32)

    kernel = functools.partial(_attention_kernel, patches=P, pixels=n,
                               heads=heads, dim_head=dim_head,
                               project_out=project_out)

    out = pl.pallas_call(
        kernel,
        out_shape=jax.ShapeDtypeStruct((B, P * n, dim), jnp.float32),
        grid_spec=pltpu.PrefetchScalarGridSpec(
            num_scalar_prefetch=0,
            grid=(B,),
            in_specs=[
                pl.BlockSpec((1, P * n, dim), lambda b: (b, 0, 0)),
                pl.BlockSpec((dim, 3 * inner), lambda b: (0, 0)),
                pl.BlockSpec((inner, dim), lambda b: (0, 0)),
                pl.BlockSpec((1, dim), lambda b: (0, 0)),
            ],
            out_specs=pl.BlockSpec((1, P * n, dim), lambda b: (b, 0, 0)),
        ),
        compiler_params=pltpu.CompilerParams(
            dimension_semantics=("parallel",)),
        # TODO(synk): for production MobileViT sizes (large P), also tile the
        # grid over P with a row-block so per-step VMEM stays under the v7x
        # 64 MiB budget; unnecessary at these shapes.
    )(x3, wqkv_t, wout_t, bout2)
    return out.reshape(B, P, n, dim)


# -----------------------------------------------------------------------------
# Pure-JAX reference mirroring the PyTorch module exactly.
# -----------------------------------------------------------------------------
def attention_reference(x, w_qkv, w_out, b_out, *, heads, dim_head):
    b, p, n, dim = x.shape
    inner = heads * dim_head
    scale = dim_head ** (-0.5)
    project_out = not (heads == 1 and dim_head == dim)

    qkv = jnp.einsum('bpnd,ed->bpne', x, w_qkv)                  # (b,p,n,3*inner)
    q, k, v = jnp.split(qkv, 3, axis=-1)
    q = q.reshape(b, p, heads, n, dim_head)
    k = k.reshape(b, p, heads, n, dim_head)
    v = v.reshape(b, p, heads, n, dim_head)

    dots = jnp.einsum('bphnd,bphmd->bphnm', q, k) * scale
    attn = jax.nn.softmax(dots, axis=-1)
    out = jnp.einsum('bphnm,bphmd->bphnd', attn, v)
    out = out.reshape(b, p, n, inner)
    if project_out:
        out = jnp.einsum('bpni,oi->bpno', out, w_out) + b_out
    return out


# -----------------------------------------------------------------------------
# Deterministic parameter init (PyTorch layouts: Linear weight = (out, in)).
# -----------------------------------------------------------------------------
def init_params(key, dim, heads, dim_head):
    inner = heads * dim_head
    k1, k2, k3 = jax.random.split(key, 3)
    return {
        "w_qkv": 0.1 * jax.random.normal(k1, (3 * inner, dim), jnp.float32),
        "w_out": 0.1 * jax.random.normal(k2, (dim, inner), jnp.float32),
        "b_out": 0.05 * jax.random.normal(k3, (dim,), jnp.float32),
    }


if __name__ == "__main__":
    key = jax.random.PRNGKey(0)
    k_x, k_p = jax.random.split(key)

    # Small shapes consistent with the module: (batch, patches, pixels, dim).
    B, P, N, DIM = 2, 4, 8, 64
    HEADS, DIM_HEAD = 8, 8          # inner_dim = 64, project_out = True

    x = jax.random.normal(k_x, (B, P, N, DIM), jnp.float32)
    params = init_params(k_p, DIM, HEADS, DIM_HEAD)

    out = attention_forward(x, params["w_qkv"], params["w_out"], params["b_out"],
                            heads=HEADS, dim_head=DIM_HEAD)
    out = jax.block_until_ready(out)

    ref = attention_reference(x, params["w_qkv"], params["w_out"], params["b_out"],
                              heads=HEADS, dim_head=DIM_HEAD)
    assert out.shape == ref.shape == (B, P, N, DIM)
    assert jnp.allclose(out, ref, atol=1e-4, rtol=1e-4), \
        f"max abs diff {jnp.max(jnp.abs(out - ref))}"

    print("KERNEL_OK")
</pallas_src>

<mosaic_0001>
module attributes {stable_mosaic.version = 11 : i64} {
  func.func @_attention_kernel(%arg0: i32, %arg1: memref<1x32x64xf32, #tpu.memory_space<vmem>>, %arg2: memref<64x192xf32, #tpu.memory_space<vmem>>, %arg3: memref<64x64xf32, #tpu.memory_space<vmem>>, %arg4: memref<1x64xf32, #tpu.memory_space<vmem>>, %arg5: memref<1x32x64xf32, #tpu.memory_space<vmem>>) attributes {dimension_semantics = [#tpu.dimension_semantics<parallel>], iteration_bounds = array<i64: 2>, scalar_prefetch = 0 : i64, scratch_operands = 0 : i64, tpu.core_type = #tpu.core_type<tc>, window_params = [{transform_indices = @transform_0, window_bounds = array<i64: 1, 32, 64>}, {pipeline_mode = #tpu.pipeline_mode<synchronous>, transform_indices = @transform_1, window_bounds = array<i64: 64, 192>}, {pipeline_mode = #tpu.pipeline_mode<synchronous>, transform_indices = @transform_2, window_bounds = array<i64: 64, 64>}, {pipeline_mode = #tpu.pipeline_mode<synchronous>, transform_indices = @transform_3, window_bounds = array<i64: 1, 64>}, {transform_indices = @transform_4, window_bounds = array<i64: 1, 32, 64>}]} {
    %c0 = arith.constant 0 : index
    %c0_0 = arith.constant 0 : index
    %c0_1 = arith.constant 0 : index
    %0 = vector.load %arg1[%c0, %c0_0, %c0_1] : memref<1x32x64xf32, #tpu.memory_space<vmem>>, vector<1x32x64xf32>
    %1 = vector.shape_cast %0 : vector<1x32x64xf32> to vector<32x64xf32>
    %c0_2 = arith.constant 0 : index
    %c0_3 = arith.constant 0 : index
    %2 = vector.load %arg2[%c0_2, %c0_3] : memref<64x192xf32, #tpu.memory_space<vmem>>, vector<64x192xf32>
    %cst = arith.constant dense<0.000000e+00> : vector<32x192xf32>
    %3 = tpu.matmul %1, %2, %cst {dimension_numbers = #tpu.dot_dimension_numbers<[1], [0], [0], [1], [0, 0, 1, 1], [], []>} : vector<32x64xf32>, vector<64x192xf32>, vector<32x192xf32> -> vector<32x192xf32>
    %4 = vector.extract_strided_slice %3 {offsets = [0, 0], sizes = [32, 64], strides = [1, 1]} : vector<32x192xf32> to vector<32x64xf32>
    %5 = vector.shape_cast %4 : vector<32x64xf32> to vector<32x8x8xf32>
    %6 = vector.extract_strided_slice %3 {offsets = [0, 64], sizes = [32, 64], strides = [1, 1]} : vector<32x192xf32> to vector<32x64xf32>
    %7 = vector.shape_cast %6 : vector<32x64xf32> to vector<32x8x8xf32>
    %8 = vector.extract_strided_slice %3 {offsets = [0, 128], sizes = [32, 64], strides = [1, 1]} : vector<32x192xf32> to vector<32x64xf32>
    %9 = vector.shape_cast %8 : vector<32x64xf32> to vector<32x8x8xf32>
    "tpu.trace_start"() <{level = 10 : i32, message = "bnd,bmd->bnm"}> : () -> ()
    %cst_4 = arith.constant dense<0.000000e+00> : vector<32x8x8xf32>
    %10 = tpu.matmul %5, %7, %cst_4 {dimension_numbers = #tpu.dot_dimension_numbers<[2], [2], [1], [1], [0, 0, 0, 1, 1, 1], [0], [0]>} : vector<32x8x8xf32>, vector<32x8x8xf32>, vector<32x8x8xf32> -> vector<32x8x8xf32>
    "tpu.trace_stop"() : () -> ()
    %cst_5 = arith.constant dense<0xFF800000> : vector<32x8xf32>
    %11 = vector.multi_reduction <maximumf>, %10, %cst_5 [2] : vector<32x8x8xf32> to vector<32x8xf32>
    %12 = vector.shape_cast %11 : vector<32x8xf32> to vector<32x8x1xf32>
    %13 = vector.broadcast %12 : vector<32x8x1xf32> to vector<32x8x8xf32>
    %14 = arith.subf %10, %13 : vector<32x8x8xf32>
    %15 = math.exp %14 : vector<32x8x8xf32>
    %cst_6 = arith.constant dense<0.000000e+00> : vector<32x8xf32>
    %16 = vector.multi_reduction <add>, %15, %cst_6 [2] : vector<32x8x8xf32> to vector<32x8xf32>
    %17 = vector.shape_cast %16 : vector<32x8xf32> to vector<32x8x1xf32>
    %18 = vector.broadcast %17 : vector<32x8x1xf32> to vector<32x8x8xf32>
    %19 = arith.divf %15, %18 : vector<32x8x8xf32>
    "tpu.trace_start"() <{level = 10 : i32, message = "bnm,bmd->bnd"}> : () -> ()
    %cst_7 = arith.constant dense<0.000000e+00> : vector<32x8x8xf32>
    %20 = tpu.matmul %19, %9, %cst_7 {dimension_numbers = #tpu.dot_dimension_numbers<[2], [1], [1], [2], [0, 0, 0, 1, 1, 2], [0], [0]>} : vector<32x8x8xf32>, vector<32x8x8xf32>, vector<32x8x8xf32> -> vector<32x8x8xf32>
    "tpu.trace_stop"() : () -> ()
    %21 = vector.shape_cast %20 : vector<32x8x8xf32> to vector<32x64xf32>
    %c0_8 = arith.constant 0 : index
    %c0_9 = arith.constant 0 : index
    %22 = vector.load %arg3[%c0_8, %c0_9] : memref<64x64xf32, #tpu.memory_space<vmem>>, vector<64x64xf32>
    %cst_10 = arith.constant dense<0.000000e+00> : vector<32x64xf32>
    %23 = tpu.matmul %21, %22, %cst_10 {dimension_numbers = #tpu.dot_dimension_numbers<[1], [0], [0], [1], [0, 0, 1, 1], [], []>} : vector<32x64xf32>, vector<64x64xf32>, vector<32x64xf32> -> vector<32x64xf32>
    %c0_11 = arith.constant 0 : index
    %c0_12 = arith.constant 0 : index
    %24 = vector.load %arg4[%c0_11, %c0_12] : memref<1x64xf32, #tpu.memory_space<vmem>>, vector<1x64xf32>
    %25 = vector.broadcast %24 : vector<1x64xf32> to vector<32x64xf32>
    %26 = arith.addf %23, %25 : vector<32x64xf32>
    %c0_13 = arith.constant 0 : index
    %c0_14 = arith.constant 0 : index
    %c0_15 = arith.constant 0 : index
    %27 = vector.load %arg5[%c0_13, %c0_14, %c0_15] : memref<1x32x64xf32, #tpu.memory_space<vmem>>, vector<1x32x64xf32>
    %28 = vector.shape_cast %27 : vector<1x32x64xf32> to vector<32x64xf32>
    %29 = vector.shape_cast %26 : vector<32x64xf32> to vector<1x32x64xf32>
    tpu.vector_store %arg5[%c0_13, %c0_14, %c0_15], %29 {strides = array<i32>} : memref<1x32x64xf32, #tpu.memory_space<vmem>>, vector<1x32x64xf32>,
    return
  }
  func.func @transform_0(%arg0: i32) -> (i32, i32, i32) {
    %c0_i32 = arith.constant 0 : i32
    %c0_i32_0 = arith.constant 0 : i32
    %c0_i32_1 = arith.constant 0 : i32
    return %arg0, %c0_i32, %c0_i32_0 : i32, i32, i32
  }
  func.func @transform_1(%arg0: i32) -> (i32, i32) {
    %c0_i32 = arith.constant 0 : i32
    %c0_i32_0 = arith.constant 0 : i32
    %c0_i32_1 = arith.constant 0 : i32
    return %c0_i32, %c0_i32_0 : i32, i32
  }
  func.func @transform_2(%arg0: i32) -> (i32, i32) {
    %c0_i32 = arith.constant 0 : i32
    %c0_i32_0 = arith.constant 0 : i32
    %c0_i32_1 = arith.constant 0 : i32
    return %c0_i32, %c0_i32_0 : i32, i32
  }
  func.func @transform_3(%arg0: i32) -> (i32, i32) {
    %c0_i32 = arith.constant 0 : i32
    %c0_i32_0 = arith.constant 0 : i32
    %c0_i32_1 = arith.constant 0 : i32
    return %c0_i32, %c0_i32_0 : i32, i32
  }
  func.func @transform_4(%arg0: i32) -> (i32, i32, i32) {
    %c0_i32 = arith.constant 0 : i32
    %c0_i32_0 = arith.constant 0 : i32
    %c0_i32_1 = arith.constant 0 : i32
    return %arg0, %c0_i32, %c0_i32_0 : i32, i32, i32
  }
}

</mosaic_0001>

<bundles_post_ra>
// kernel: tpu_custom_call.1
= control target key start
LH: loop header
LB: loop body
LE: loop exit
PB: predicated region body
PF: predicated region fallthrough
CT: control target
= control target key end

     0   :  { %9 = vsyncpa [#allocation3], 0  ;;  %s11545_s0 = inlined_call_operand.hbm [shape: f32[2,32,64], index: 0, kind: input, shape index: {}]   ;;  %s11546_s1 = inlined_call_operand.hbm [shape: f32[64,192], index: 1, kind: input, shape index: {}]   ;;  %s11547_s2 = inlined_call_operand.hbm [shape: f32[64,64], index: 2, kind: input, shape index: {}]   ;;  %s11548_s3 = inlined_call_operand.vmem [shape: f32[1,64], index: 3, kind: input, shape index: {}]   ;;  %s11549_s4 = inlined_call_operand.hbm [shape: f32[2,32,64], index: 4, kind: output, shape index: {}]  }
   0x1   :  { %11 = vsyncpa [#allocation3 + $0x1], 0 }
   0x2   :  { %12 = vsyncpa [#allocation6], 0 }
   0x3   :  { %13 = vsyncpa [#allocation4], 0 }
   0x4   :  { %15 = vsyncpa [#allocation4 + $0x1], 0  ;;  %s9373_s15 = smov 0   ;;  %s9375_s16 = smov 0  }
   0x5   :  { %s9377_s17 = smov 0   ;;  %s9379_s18 = smov 0  }
   0x6 LB: > { %s9394_s19 = sadd.s32 4294967295, %s9318_s18   ;;  %s8304_s20 = sadd.s32 4294967294, %s9318_s18   ;;  %s9318_s18 = sphi %s9379_s18, %s11669_s18   ;;  %s9314_s17 = sphi %s9377_s17, %s11668_s17   ;;  %s9310_s16 = sphi %s9375_s16, %s11667_s16   ;;  %s9306_s15 = sphi %s9373_s15, %s11666_s15  }
   0x7   : > { %p41_p0 = scmp.ne.s32.totalorder %s9310_s16, %s9306_s15  ;;  %p11550_p1 = scmp.eq.s32.totalorder %s9394_s19, 0 }
   0x8   : > { %p134_p3 = scmp.eq.s32.totalorder %s8304_s20, 1  ;;  %p8305_p5 = scmp.ge.s32.totalorder %s9318_s18, 1 }
   0x9   : > { %p9403_p4 = por %p11550_p1, %p41_p0  ;;  %p141_p7 = scmp.lt.s32.totalorder %s9318_s18, 3 }
   0xa   : > { %p9408_p6 = por %p134_p3, %p41_p0  ;;  %s9320_s24 = smov [#allocation5]  }
   0xb   : > { %s11586_s21 = scalar_select %p9403_p4, 1, 0 }
   0xc   : > { %s11587_s22 = scalar_select %p9408_p6, 1, 0 }
   0xd   : > { %p9413_p8 = pnand %p8305_p5, %p141_p7  ;;  %s153_s25 = sshll.u32 %s9320_s24, 4  ;;  %s9417_s25 = int_to_ptr.vmem [resolvable:$true] %s153_s25 }
   0xe   : > { %s9321_s27 = smov [#allocation7]   ;;  %s9162_s5 = scalar_lea.hbm %s11546_s1, 2048 }
   0xf   : > { %p8955_p9 = pneg %p9413_p8  ;;  %s166_s28 = sshll.u32 %s9321_s27, 4  ;;  %s9428_s28 = int_to_ptr.vmem [resolvable:$true] %s166_s28 }
  0x10   : > { %p9163_p12 = scmp.ne.s32.totalorder %s11546_s1, %s9162_s5  ;;  %p9169_p5 = scmp.lt.u32.totalorder %s9162_s5, %s11546_s1 }
  0x11   : > { %p9424_p11 = pnand %p8955_p9, %p11550_p1 }
  0x13   : > { %p9164_p13 = pneg %p9424_p11 }
  0x15   : > { %p9165_p0 = pnand %p9164_p13, %p9163_p12 }
  0x17   : > { %p9166_p3 = pneg %p9165_p0 }
  0x19   : > { %p9171_p7 = pnand %p9169_p5, %p9166_p3 }
  0x1b   : > { %9174 = shalt.err (!%p9171_p7)
}
  0x1c   : > { %s9175_s10 = scalar_lea.vmem %s9417_s25, 2048  ;;  %p9183_p2 = scmp.lt.s32.totalorder %s9417_s25, %s9417_s25 }
  0x1d   : > { %p9176_p9 = scmp.ne.s32.totalorder %s9417_s25, %s9175_s10  ;;  %p9184_p12 = scmp.lt.s32.totalorder %s9175_s10, %s9175_s10 }
  0x1f   : > { %p9178_p10 = pnand %p9176_p9, %p9164_p13  ;;  %p9185_p0 = por %p9184_p12, %p9183_p2 }
  0x21   : > { %p9179_p1 = pneg %p9178_p10 }
  0x23   : > { %p9186_p6 = pnand %p9185_p0, %p9179_p1 }
  0x25   : > { %9189 = shalt.err (!%p9186_p6)
}
  0x26   : > { %s9322_s11 = smov 256   ;;  %s9323_s12 = smov 16  }
  0x27   : > { %8958 = dma.hbm_to_vmem [thread:$0]  (!%p9424_p11), %s11546_s1, 2048, %s9417_s25, [#allocation6], %s9322_s11, %s9322_s11, %s9323_s12  }
  0x28   : > { %s9190_s27 = scalar_lea.hbm %s11547_s2, 1024 }
  0x29   : > { %p9191_p2 = scmp.ne.s32.totalorder %s11547_s2, %s9190_s27  ;;  %p9197_p10 = scmp.lt.u32.totalorder %s9190_s27, %s11547_s2 }
  0x2b   : > { %p9193_p1 = pnand %p9191_p2, %p9164_p13 }
  0x2d   : > { %p9194_p6 = pneg %p9193_p1 }
  0x2f   : > { %p9199_p3 = pnand %p9197_p10, %p9194_p6 }
  0x31   : > { %9202 = shalt.err (!%p9199_p3)
}
  0x32   : > { %s9203_s25 = scalar_lea.vmem %s9428_s28, 1024  ;;  %p9211_p12 = scmp.lt.s32.totalorder %s9428_s28, %s9428_s28 }
  0x33   : > { %p9204_p5 = scmp.ne.s32.totalorder %s9428_s28, %s9203_s25  ;;  %p9212_p0 = scmp.lt.s32.totalorder %s9203_s25, %s9203_s25 }
  0x35   : > { %p9206_p7 = pnand %p9204_p5, %p9164_p13  ;;  %p9213_p2 = por %p9212_p0, %p9211_p12 }
  0x37   : > { %p9207_p9 = pneg %p9206_p7 }
  0x39   : > { %p9214_p1 = pnand %p9213_p2, %p9207_p9 }
  0x3b   : > { %9217 = shalt.err (!%p9214_p1)
}
  0x3c   : > { %s9324_s7 = smov 128   ;;  %s9325_s8 = smov 8  }
  0x3d   : > { %8961 = dma.hbm_to_vmem [thread:$0]  (!%p9424_p11), %s11547_s2, 1024, %s9428_s28, [#allocation6], %s9324_s7, %s9324_s7, %s9325_s8  }
  0x3e   : > { %s9486_s11 = sadd.s32 1, %s9318_s18   ;;  %s28_s13 = sadd.s32 1, %s9314_s17 }
  0x3f   : > { %s25_s12 = ssub.s32 %s9318_s18, %s9486_s11  ;;  %p35_p6 = scmp.ne.s32.totalorder %s9314_s17, %s9310_s16 }
  0x40   : > { %p26_p13 = scmp.eq.s32.totalorder %s25_s12, 0  ;;  %p36_p10 = scmp.eq.s32.totalorder %s9318_s18, 0 }
  0x41   : > { %p11590_p5 = scmp.eq.s32.totalorder %s9394_s19, 1  ;;  %p8972_p9 = scmp.lt.s32.totalorder %s9318_s18, 2 }
  0x42   : > { %s9495_s14 = scalar_select %p26_p13, %s9314_s17, %s28_s13  }
  0x43   : > { %p37_p3 = por %p36_p10, %p35_p6  ;;  %p9499_p7 = por %p11590_p5, %p35_p6 }
  0x44   : > { %s183_s20 = sand.u32 1, %s9314_s17   ;;  %s8427_s28 = sshll.u32 %s9318_s18, 9 }
  0x45   : > { %s11591_s26 = scalar_select %p9499_p7, 1, 0 }
  0x46   : > { %s8309_s24 = sshll.u32 %s183_s20, 5  ;;  %s9509_s30 = scalar_lea.hbm %s11545_s0, %s8427_s28 }
  0x47   : > { %s187_s5 = scalar_lea.vmem [#allocation2], %s8309_s24  ;;  %p9513_p11 = pnand %p8972_p9, %p37_p3 }
  0x48   : > { %s194_s6 = sshll.u32 %s187_s5, 4  ;;  %s9517_s9 = scalar_lea.sflag [#allocation3], %s183_s20  ;;  %s9511_s6 = int_to_ptr.vmem [resolvable:$true] %s194_s6 }
  0x49   : > { %s9218_s10 = scalar_lea.hbm %s9509_s30, 512  ;;  %p9220_p0 = pneg %p9513_p11 }
  0x4a   : > { %p9219_p12 = scmp.ne.s32.totalorder %s9509_s30, %s9218_s10  ;;  %s9223_s24 = scalar_lea.hbm %s11545_s0, 1024 }
  0x4b   : > { %p9224_p13 = scmp.lt.u32.totalorder %s9509_s30, %s11545_s0  ;;  %p9225_p6 = scmp.lt.u32.totalorder %s9223_s24, %s9218_s10 }
  0x4c   : > { %p9221_p2 = pnand %p9220_p0, %p9219_p12  ;;  %p9227_p3 = scmp.lt.u32.totalorder %s9218_s10, %s9509_s30 }
  0x4d   : > { %p9226_p10 = por %p9225_p6, %p9224_p13 }
  0x4e   : > { %p9222_p1 = pneg %p9221_p2 }
  0x4f   : > { %p9228_p5 = por %p9227_p3, %p9226_p10 }
  0x51   : > { %p9229_p9 = pnand %p9228_p5, %p9222_p1 }
  0x53   : > { %9232 = shalt.err (!%p9229_p9)
}
  0x54   : > { %s9233_s20 = scalar_lea.vmem %s9511_s6, 512  ;;  %s9326_s29 = smov [#allocation2]  }
  0x55   : > { %p9234_p12 = scmp.ne.s32.totalorder %s9511_s6, %s9233_s20  ;;  %s9238_s5 = sshll.u32 %s9326_s29, 4  ;;  %s9239_s5 = int_to_ptr.vmem [resolvable:$false] %s9238_s5 }
  0x56   : > { %s9240_s12 = scalar_lea.vmem %s9239_s5, 1024  ;;  %p9241_p4 = scmp.lt.s32.totalorder %s9511_s6, %s9239_s5 }
  0x57   : > { %p9236_p2 = pnand %p9234_p12, %p9220_p0  ;;  %p9242_p13 = scmp.lt.s32.totalorder %s9240_s12, %s9233_s20 }
  0x59   : > { %p9237_p7 = pneg %p9236_p2  ;;  %p9243_p6 = por %p9242_p13, %p9241_p4 }
  0x5b   : > { %p9244_p10 = pnand %p9243_p6, %p9237_p7 }
  0x5d   : > { %9247 = shalt.err (!%p9244_p10)
}
  0x5e   : > { %8965 = dma.hbm_to_vmem [thread:$0]  (!%p9513_p11), %s9509_s30, 512, %s9511_s6, %s9517_s9, %s9324_s7, %s9324_s7, %s9325_s8  }
  0x5f   : > { %206 = sbr.rel (%p9413_p8) target bundleno = 1791 (0x6ff), region = 36 }
  0x66   : > { %s9551_s10 = sand.u32 1, %s9310_s16   ;;  %p11593_p4 = scmp.ne.s32.totalorder %s11586_s21, 0 }
  0x67   : > { %s8313_s13 = sshll.u32 %s9551_s10, 5  ;;  %s209_s24 = scalar_lea.sflag [#allocation3], %s9551_s10 }
  0x68   : > { %s9557_s25 = scalar_lea.vmem [#allocation2], %s8313_s13 }
  0x69   : > { %9293 = dma.done.wait (%p11593_p4), %s209_s24, 512  }
  0x6a   : > { %9295 = vsyncadd (%p11593_p4), %s209_s24, 4294966784  ;;  %p11594_p7 = scmp.eq.s32.totalorder %s9394_s19, 0 }
  0x6c   : > { %9297 = dma.done.wait (%p11594_p7), [#allocation6], 3072   ;;  %p11595_p8 = pmov %p11594_p7 }
  0x6d   : > { %v11553_v0 = vmov 0.0   ;;  %v250_v1 = vld [vmem:[#allocation5 + $0x8] sm:$0xff]  ;;  %v252_v2 = vld [vmem:[#allocation5 + $0x18] sm:$0xff]  ;;  %v249_v3 = vld [vmem:[#allocation5] sm:$0xff]  ;;  %vm265_vm0 = vcmask 523264   ;;  %s9328_s21 = smov 104  }
  0x6e   : > { %9299 = vsyncadd (%p11595_p8), [#allocation6], 4294964224  ;;  %342 = vmatprep.mubr.f32.mxu0 %v11553_v0  ;;  %8579 = vmatprep.subr.mxu1 %v11553_v0  ;;  %v8911_v4 = vpack.c.bf16 %v252_v2, %v250_v1  ;;  %v251_v5 = vld [vmem:[#allocation5 + $0x10] sm:$0xff]  ;;  %v254_v6 = vld [vmem:[#allocation5 + $0x28] sm:$0xff]  ;;  %s9329_s23 = smov 120   ;;  %s9330_s7 = smov 96  }
  0x6f   : > { %v256_v7 = vld [vmem:[#allocation5 + $0x38] sm:$0xff]  ;;  %v8913_v8 = vpack.c.bf16 %v251_v5, %v249_v3  ;;  %v253_v10 = vld [vmem:[#allocation5 + $0x20] sm:$0xff]  ;;  %v255_v11 = vld [vmem:[#allocation5 + $0x30] sm:$0xff]  ;;  %s9331_s8 = smov 112   ;;  %s9332_s30 = smov 80   ;;  %vm9336_vm1 = vmmov 0   ;;  %v460_v5 = vlaneseq }
  0x70   : > { %v8915_v9 = vpack.c.bf16 %v256_v7, %v254_v6  ;;  %v258_v12 = vld [vmem:[#allocation5 + $0x48] sm:$0xff]  ;;  %8912 = vmatprep.subr.bf16.mxu0 %v8911_v4  ;;  %v260_v13 = vld [vmem:[#allocation5 + $0x58] sm:$0xff]  ;;  %v8917_v14 = vpack.c.bf16 %v255_v11, %v253_v10  ;;  %v257_v16 = vld [vmem:[#allocation5 + $0x40] sm:$0xff]  ;;  %s9333_s6 = smov 88   ;;  %s9334_s9 = smov 72   ;;  %8581 = vmatprep.mubr.msk.f32.mxu1 %vm9336_vm1, %v11553_v0  ;;  %vm2271_vm2 = vcmask 64512  }
  0x71   : > { %8914 = vmatpush1.bf16.msra.mxu0 %v8913_v8  ;;  %v8919_v15 = vpack.c.bf16 %v260_v13, %v258_v12  ;;  %v259_v17 = vld [vmem:[#allocation5 + $0x50] sm:$0xff]  ;;  %v262_v18 = vld [vmem:[#allocation5 + $0x68] sm:$0xff]  ;;  %v264_v19 = vld [vmem:[#allocation5 + $0x78] sm:$0xff]  ;;  %s9335_s28 = smov 64   ;;  %v9337_v3 = vmov 1983009808  }
  0x72   : > { %8916 = vmatprep.subr.bf16.mxu0 %v8915_v9  ;;  %v8921_v20 = vpack.c.bf16 %v259_v17, %v257_v16  ;;  %v8923_v21 = vpack.c.bf16 %v264_v19, %v262_v18  ;;  %v261_v22 = vld [vmem:[#allocation5 + $0x60] sm:$0xff]  ;;  %v263_v23 = vld [vmem:[#allocation5 + $0x70] sm:$0xff]  ;;  %v246_v26 = vld [vmem:[%s9557_s25 + $0x8] sm:$0xff]  ;;  %v458_v4 = vunpack.c.l.s4 %v9337_v3  ;;  %v461_v7 = vshrl.u32 %v460_v5, 7  ;;  %s9339_s27 = smov 40   ;;  %s9340_s20 = smov 8  }
  0x73   : > { %v8925_v24 = vpack.c.bf16 %v263_v23, %v261_v22  ;;  %v245_v25 = vld [vmem:[%s9557_s25] sm:$0xff]  ;;  %v247_v27 = vld [vmem:[%s9557_s25 + $0x10] sm:$0xff]  ;;  %v248_v28 = vld [vmem:[%s9557_s25 + $0x18] sm:$0xff]  ;;  %v9338_v8 = vmov 1934713408   ;;  %s9341_s29 = smov 48  }
  0x74   : > { %v459_v6 = vunpack.c.0.s8 %v458_v4  ;;  %v522_v9 = vunpack.c.l.s4 %v9338_v8  ;;  %s9342_s5 = smov 16   ;;  %s9343_s12 = smov 56   ;;  %vm8052_vm3 = vcmask 130048   ;;  %vm8057_vm4 = vcmask 195584  }
  0x75   : > { %8918 = vmatpush1.bf16.msra.mxu0 %v8917_v14  ;;  %s9344_s24 = smov 24   ;;  %s9345_s25 = smov 32   ;;  %vm8062_vm5 = vcmask 261120   ;;  %vm8067_vm6 = vcmask 326656   ;;  %vm8072_vm7 = vcmask 392192   ;;  %vm8077_vm8 = vcmask 457728  }
  0x76   : > { %8920 = vmatprep.subr.bf16.mxu0 %v8919_v15  ;;  %v9829_v13 = vsub.s32 %v459_v6, %v461_v7  ;;  %v523_v19 = vunpack.c.0.s8 %v522_v9  ;;  %p11663_p0 = scmp.ne.s32.totalorder %s11591_s26, 0 }
  0x79   : > { %8922 = vmatpush1.bf16.msra.mxu0 %v8921_v20 }
  0x7a   : > { %8924 = vmatprep.subr.bf16.mxu0 %v8923_v21 }
  0x7d   : > { %8926 = vmatpush1.bf16.msra.mxu0 %v8925_v24 }
  0x7e   : > { %8569 = vmatprep.subr.mxu0 %v11553_v0 }
  0x80   : > { %8317 = vmatmul.mubr.msk.f32.vlgmr.msra.gmra.mrb[0].mxu0 %vm265_vm0, %v245_v25 }
  0x81   : > { %348 = vmatprep.mubr.f32.mxu0 %v11553_v0 }
  0x84   : > { %8318 = vmatmul.mubr.msk.f32.gmra.mrb[2].mxu0 %vm265_vm0, %v246_v26 }
  0x85   : > { %354 = vmatprep.mubr.f32.mxu0 %v11553_v0 }
  0x88   : > { %8319 = vmatmul.mubr.msk.f32.gmra.mrb[4].mxu0 %vm265_vm0, %v247_v27 }
  0x89   : > { %360 = vmatprep.mubr.f32.mxu0 %v11553_v0 }
  0x8c   : > { %8320 = vmatmul.mubr.msk.f32.gmra.mrb[6].mxu0 %vm265_vm0, %v248_v28  ;;  %v9851_v28 = vsub.s32 %v523_v19, %v461_v7 }
  0x8d   : > { %8571 = vmatprep.mubr.msk.f32.mxu0 %vm9336_vm1, %v11553_v0 }
 0x153   : > { %v9581_v29 = vpop.f32.mrb[0].mxu0 }
 0x154   : > { %395 = vrot.lane.b32.xlu1 %v9581_v29, %s9328_s21  ;;  %371 = vrot.lane.b32.xlu0 %v9581_v29, %s9329_s23  ;;  %v9587_v30 = vpop.f32.mrb[1].mxu0 }
 0x157   : > { %v9589_v31 = vpop.f32.mrb[2].mxu0 }
 0x158   : > { %407 = vrot.lane.b32.xlu1 %v9581_v29, %s9330_s7  ;;  %383 = vrot.lane.b32.xlu0 %v9581_v29, %s9331_s8  ;;  %v9595_v32 = vpop.f32.mrb[3].mxu0 }
 0x159   : > { %11596 = vst [vmem:[#allocation12_spill] sm:$0xff] %v9595_v32 }
 0x15b   : > { %v9597_v33 = vpop.f32.mrb[4].mxu0 }
 0x15c   : > { %431 = vrot.lane.b32.xlu1 %v9581_v29, %s9332_s30  ;;  %419 = vrot.lane.b32.xlu0 %v9581_v29, %s9333_s6  ;;  %v9603_v34 = vpop.f32.mrb[5].mxu0 }
 0x15f   : > { %v9605_v35 = vpop.f32.mrb[6].mxu0 }
 0x160   : > { %443 = vrot.lane.b32.xlu0 %v9581_v29, %s9334_s9  ;;  %373 = vrot.lane.b32.xlu1 %v9589_v31, %s9329_s23  ;;  %v9611_v36 = vpop.f32.mrb[7].mxu0 }
 0x164   : > { %999 = vrot.lane.b32.xlu0 %v9581_v29, %s9335_s28  ;;  %397 = vrot.lane.b32.xlu1 %v9589_v31, %s9328_s21 }
 0x168   : > { %385 = vrot.lane.b32.xlu0 %v9589_v31, %s9331_s8  ;;  %421 = vrot.lane.b32.xlu1 %v9589_v31, %s9333_s6 }
 0x16c   : > { %409 = vrot.lane.b32.xlu0 %v9589_v31, %s9330_s7  ;;  %445 = vrot.lane.b32.xlu1 %v9589_v31, %s9334_s9 }
 0x170   : > { %433 = vrot.lane.b32.xlu0 %v9589_v31, %s9332_s30  ;;  %387 = vrot.lane.b32.xlu1 %v9597_v33, %s9331_s8 }
 0x174   : > { %375 = vrot.lane.b32.xlu0 %v9597_v33, %s9329_s23  ;;  %411 = vrot.lane.b32.xlu1 %v9597_v33, %s9330_s7 }
 0x178   : > { %399 = vrot.lane.b32.xlu0 %v9597_v33, %s9328_s21  ;;  %435 = vrot.lane.b32.xlu1 %v9597_v33, %s9332_s30 }
 0x17c   : > { %423 = vrot.lane.b32.xlu0 %v9597_v33, %s9333_s6  ;;  %377 = vrot.lane.b32.xlu1 %v9605_v35, %s9329_s23 }
 0x180   : > { %447 = vrot.lane.b32.xlu0 %v9597_v33, %s9334_s9  ;;  %401 = vrot.lane.b32.xlu1 %v9605_v35, %s9328_s21 }
 0x184   : > { %389 = vrot.lane.b32.xlu0 %v9605_v35, %s9331_s8  ;;  %425 = vrot.lane.b32.xlu1 %v9605_v35, %s9333_s6 }
 0x188   : > { %413 = vrot.lane.b32.xlu0 %v9605_v35, %s9330_s7  ;;  %449 = vrot.lane.b32.xlu1 %v9605_v35, %s9334_s9 }
 0x18c   : > { %437 = vrot.lane.b32.xlu0 %v9605_v35, %s9332_s30 }
 0x1c6   : > { %v9655_v37 = vpop.permute.xlu1 %395  ;;  %v9657_v38 = vpop.permute.xlu0 %371 }
 0x1c7   : > { %1007 = vrot.lane.b32.xlu1 %v9657_v38, %s9335_s28  ;;  %v471_v16 = vcombine.low %v9657_v38, %v9655_v37  ;;  %v472_v18 = vcombine.high %v9657_v38, %v9655_v37 }
 0x1c9   : > { %v479_v25 = vrot.slane %v471_v16, %v9829_v13  ;;  %v486_v27 = vrot.slane %v472_v18, %v9829_v13 }
 0x1ca   : > { %v9661_v39 = vpop.permute.xlu1 %407  ;;  %v9663_v40 = vpop.permute.xlu0 %383 }
 0x1cb   : > { %1015 = vrot.lane.b32.xlu0 %v9663_v40, %s9335_s28  ;;  %1023 = vrot.lane.b32.xlu1 %v9655_v37, %s9335_s28  ;;  %v455_v11 = vcombine.low %v9581_v29, %v9663_v40  ;;  %v456_v14 = vcombine.high %v9581_v29, %v9663_v40 }
 0x1cd   : > { %v463_v21 = vrot.slane %v455_v11, %v9829_v13  ;;  %v470_v23 = vrot.slane %v456_v14, %v9829_v13 }
 0x1ce   : > { %v9669_v41 = vpop.permute.xlu1 %431  ;;  %v9671_v42 = vpop.permute.xlu0 %419 }
 0x1cf   : > { %1031 = vrot.lane.b32.xlu0 %v9661_v39, %s9335_s28  ;;  %1039 = vrot.lane.b32.xlu1 %v9671_v42, %s9335_s28  ;;  %v487_v15 = vcombine.low %v9661_v39, %v9669_v41  ;;  %v488_v17 = vcombine.high %v9661_v39, %v9669_v41  ;;  %v519_v38 = vcombine.low %v463_v21, %v479_v25 }
 0x1d0   : > { %v536_v4 = vcombine.high %v470_v23, %v486_v27 }
 0x1d1   : > { %v495_v24 = vrot.slane %v487_v15, %v9829_v13  ;;  %v502_v26 = vrot.slane %v488_v17, %v9829_v13  ;;  %v9874_v11 = vrot.slane %v519_v38, %v9851_v28 }
 0x1d2   : > { %v9677_v43 = vpop.permute.xlu0 %443  ;;  %v9679_v44 = vpop.permute.xlu1 %373  ;;  %v9898_v18 = vrot.slane %v536_v4, %v9851_v28 }
 0x1d3   : > { %1047 = vrot.lane.b32.xlu0 %v9669_v41, %s9335_s28  ;;  %1055 = vrot.lane.b32.xlu1 %v9677_v43, %s9335_s28  ;;  %v503_v10 = vcombine.low %v9671_v42, %v9677_v43  ;;  %v504_v12 = vcombine.high %v9671_v42, %v9677_v43  ;;  %v520_v42 = vcombine.high %v463_v21, %v479_v25 }
 0x1d4   : > { %v535_v43 = vcombine.low %v470_v23, %v486_v27 }
 0x1d5   : > { %v511_v20 = vrot.slane %v503_v10, %v9829_v13  ;;  %v518_v22 = vrot.slane %v504_v12, %v9829_v13  ;;  %v9895_v17 = vrot.slane %v520_v42, %v9851_v28 }
 0x1d6   : > { %v9689_v45 = vpop.permute.xlu0 %999  ;;  %v9691_v46 = vpop.permute.xlu1 %397 }
 0x1d7   : > { %1001 = vrot.lane.b32.xlu0 %v9589_v31, %s9335_s28  ;;  %1009 = vrot.lane.b32.xlu1 %v9679_v44, %s9335_s28  ;;  %v551_v29 = vcombine.low %v495_v24, %v511_v20  ;;  %v552_v37 = vcombine.high %v495_v24, %v511_v20  ;;  %v567_v39 = vcombine.low %v502_v26, %v518_v22 }
 0x1d8   : > { %v607_v40 = vcombine.low %v9679_v44, %v9691_v46  ;;  %v568_v5 = vcombine.high %v502_v26, %v518_v22  ;;  %v608_v6 = vcombine.high %v9679_v44, %v9691_v46 }
 0x1d9   : > { %v9866_v8 = vrot.slane %v551_v29, %v9851_v28  ;;  %v9871_v10 = vrot.slane %v552_v37, %v9851_v28  ;;  %v9877_v12 = vrot.slane %v567_v39, %v9851_v28 }
 0x1da   : > { %v9697_v47 = vpop.permute.xlu0 %385  ;;  %v9699_v48 = vpop.permute.xlu1 %421  ;;  %v615_v44 = vrot.slane %v607_v40, %v9829_v13  ;;  %v9901_v19 = vrot.slane %v568_v5, %v9851_v28  ;;  %v622_v20 = vrot.slane %v608_v6, %v9829_v13 }
 0x1db   : > { %1017 = vrot.lane.b32.xlu0 %v9697_v47, %s9335_s28  ;;  %1025 = vrot.lane.b32.xlu1 %v9691_v46, %s9335_s28  ;;  %v591_v41 = vcombine.low %v9589_v31, %v9697_v47  ;;  %v592_v7 = vcombine.high %v9589_v31, %v9697_v47  ;;  %v9884_v31 = vrot.slane %v535_v43, %v9851_v28 }
 0x1dd   : > { %v599_v46 = vrot.slane %v591_v41, %v9829_v13  ;;  %v606_v21 = vrot.slane %v592_v7, %v9829_v13 }
 0x1de   : > { %v9705_v49 = vpop.permute.xlu0 %409  ;;  %v9707_v50 = vpop.permute.xlu1 %445 }
 0x1df   : > { %1033 = vrot.lane.b32.xlu0 %v9705_v49, %s9335_s28  ;;  %1041 = vrot.lane.b32.xlu1 %v9699_v48, %s9335_s28  ;;  %v639_v47 = vcombine.low %v9699_v48, %v9707_v50  ;;  %v655_v24 = vcombine.low %v599_v46, %v615_v44  ;;  %v656_v39 = vcombine.high %v599_v46, %v615_v44 }
 0x1e0   : > { %v671_v40 = vcombine.low %v606_v21, %v622_v20  ;;  %v672_v41 = vcombine.high %v606_v21, %v622_v20 }
 0x1e1   : > { %v9943_v27 = vrot.slane %v656_v39, %v9851_v28 }
 0x1e2   : > { %v9713_v51 = vpop.permute.xlu0 %433  ;;  %v9715_v52 = vpop.permute.xlu1 %387 }
 0x1e3   : > { %1049 = vrot.lane.b32.xlu0 %v9713_v51, %s9335_s28  ;;  %1057 = vrot.lane.b32.xlu1 %v9707_v50, %s9335_s28  ;;  %v623_v9 = vcombine.low %v9705_v49, %v9713_v51  ;;  %v624_v14 = vcombine.high %v9705_v49, %v9713_v51  ;;  %v640_v51 = vcombine.high %v9699_v48, %v9707_v50 }
 0x1e4   : > { %v647_v48 = vrot.slane %v639_v47, %v9829_v13  ;;  %v727_v6 = vcombine.low %v9597_v33, %v9715_v52  ;;  %v728_v7 = vcombine.high %v9597_v33, %v9715_v52 }
 0x1e5   : > { %v631_v22 = vrot.slane %v623_v9, %v9829_v13  ;;  %v638_v50 = vrot.slane %v624_v14, %v9829_v13  ;;  %v654_v4 = vrot.slane %v640_v51, %v9829_v13  ;;  %v9934_v9 = vrot.slane %v655_v24, %v9851_v28 }
 0x1e6   : > { %v9721_v53 = vpop.permute.xlu0 %375  ;;  %v9725_v54 = vpop.permute.xlu1 %411 }
 0x1e7   : > { %1003 = vrot.lane.b32.xlu0 %v9597_v33, %s9335_s28  ;;  %1011 = vrot.lane.b32.xlu1 %v9721_v53, %s9335_s28  ;;  %v687_v5 = vcombine.low %v631_v22, %v647_v48  ;;  %v688_v47 = vcombine.high %v631_v22, %v647_v48  ;;  %v703_v14 = vcombine.low %v638_v50, %v654_v4 }
 0x1e8   : > { %v704_v20 = vcombine.high %v638_v50, %v654_v4  ;;  %v9946_v33 = vrot.slane %v671_v40, %v9851_v28  ;;  %v9955_v50 = vrot.slane %v727_v6, %v9829_v13 }
 0x1e9   : > { %v9952_v48 = vrot.slane %v687_v5, %v9851_v28  ;;  %v9961_v39 = vrot.slane %v688_v47, %v9851_v28  ;;  %v9965_v46 = vrot.slane %v703_v14, %v9851_v28 }
 0x1ea   : > { %v9729_v55 = vpop.permute.xlu0 %399  ;;  %v9735_v56 = vpop.permute.xlu1 %435  ;;  %v9968_v5 = vrot.slane %v704_v20, %v9851_v28 }
 0x1eb   : > { %1019 = vrot.lane.b32.xlu0 %v9715_v52, %s9335_s28  ;;  %1027 = vrot.lane.b32.xlu1 %v9729_v55, %s9335_s28  ;;  %v9949_v52 = vrot.slane %v672_v41, %v9851_v28 }
 0x1ee   : > { %v9737_v57 = vpop.permute.xlu0 %423  ;;  %v9743_v58 = vpop.permute.xlu1 %377 }
 0x1ef   : > { %1035 = vrot.lane.b32.xlu0 %v9725_v54, %s9335_s28  ;;  %1043 = vrot.lane.b32.xlu1 %v9737_v57, %s9335_s28 }
 0x1f2   : > { %v9745_v59 = vpop.permute.xlu0 %447  ;;  %v9753_v61 = vpop.permute.xlu1 %401 }
 0x1f3   : > { %1051 = vrot.lane.b32.xlu0 %v9735_v56, %s9335_s28  ;;  %1059 = vrot.lane.b32.xlu1 %v9745_v59, %s9335_s28 }
 0x1f6   : > { %v9751_v60 = vpop.permute.xlu0 %389  ;;  %v9765_v63 = vpop.permute.xlu1 %425 }
 0x1f7   : > { %1005 = vrot.lane.b32.xlu0 %v9605_v35, %s9335_s28  ;;  %1013 = vrot.lane.b32.xlu1 %v9743_v58, %s9335_s28 }
 0x1fa   : > { %v9761_v62 = vpop.permute.xlu0 %413  ;;  %v9773_v2 = vpop.permute.xlu1 %449 }
 0x1fb   : > { %1021 = vrot.lane.b32.xlu0 %v9751_v60, %s9335_s28  ;;  %1029 = vrot.lane.b32.xlu1 %v9753_v61, %s9335_s28 }
 0x1fe   : > { %v9771_v1 = vpop.permute.xlu0 %437 }
 0x1ff   : > { %1037 = vrot.lane.b32.xlu0 %v9761_v62, %s9335_s28  ;;  %1045 = vrot.lane.b32.xlu1 %v9765_v63, %s9335_s28 }
 0x203   : > { %1053 = vrot.lane.b32.xlu0 %v9771_v1, %s9335_s28  ;;  %1061 = vrot.lane.b32.xlu1 %v9773_v2, %s9335_s28  ;;  %s8199_s28 = scalar_lea.sflag [#allocation4], %s9551_s10 }
 0x207   : > { %1655 = vrot.lane.b32.xlu0 %v9587_v30, %s9331_s8  ;;  %1643 = vrot.lane.b32.xlu1 %v9587_v30, %s9329_s23 }
 0x20b   : > { %1691 = vrot.lane.b32.xlu0 %v9587_v30, %s9333_s6  ;;  %1667 = vrot.lane.b32.xlu1 %v9587_v30, %s9328_s21 }
 0x20f   : > { %1715 = vrot.lane.b32.xlu0 %v9587_v30, %s9334_s9  ;;  %1679 = vrot.lane.b32.xlu1 %v9587_v30, %s9330_s7 }
 0x213   : > { %1645 = vrot.lane.b32.xlu0 %v9595_v32, %s9329_s23  ;;  %1703 = vrot.lane.b32.xlu1 %v9587_v30, %s9332_s30 }
 0x217   : > { %1681 = vrot.lane.b32.xlu0 %v9595_v32, %s9330_s7  ;;  %1657 = vrot.lane.b32.xlu1 %v9595_v32, %s9331_s8 }
 0x21b   : > { %1705 = vrot.lane.b32.xlu0 %v9595_v32, %s9332_s30  ;;  %1669 = vrot.lane.b32.xlu1 %v9595_v32, %s9328_s21 }
 0x21f   : > { %1659 = vrot.lane.b32.xlu0 %v9603_v34, %s9331_s8  ;;  %1693 = vrot.lane.b32.xlu1 %v9595_v32, %s9333_s6 }
 0x223   : > { %1695 = vrot.lane.b32.xlu0 %v9603_v34, %s9333_s6  ;;  %1717 = vrot.lane.b32.xlu1 %v9595_v32, %s9334_s9  ;;  %v11601_v32 = vcombine.high %v9895_v17, %v9871_v10 }
 0x227   : > { %1719 = vrot.lane.b32.xlu0 %v9603_v34, %s9334_s9  ;;  %1647 = vrot.lane.b32.xlu1 %v9603_v34, %s9329_s23 }
 0x22b   : > { %1649 = vrot.lane.b32.xlu0 %v9611_v36, %s9329_s23  ;;  %1671 = vrot.lane.b32.xlu1 %v9603_v34, %s9328_s21 }
 0x22f   : > { %1685 = vrot.lane.b32.xlu0 %v9611_v36, %s9330_s7  ;;  %1683 = vrot.lane.b32.xlu1 %v9603_v34, %s9330_s7  ;;  %s244_s7 = scalar_lea.vmem [#allocation8], %s8313_s13 }
 0x233   : > { %1707 = vrot.lane.b32.xlu1 %v9603_v34, %s9332_s30 }
 0x237   : > { %1661 = vrot.lane.b32.xlu1 %v9611_v36, %s9331_s8  ;;  %s8212_s8 = sshll.u32 %s244_s7, 4  ;;  %s11493_s8 = int_to_ptr.vmem [resolvable:$true] %s8212_s8 }
 0x239   : > { %v9859_v3 = vpop.permute.xlu1 %1007 }
 0x23b   : > { %1673 = vrot.lane.b32.xlu1 %v9611_v36, %s9328_s21 }
 0x23d   : > { %v9890_v15 = vpop.permute.xlu0 %1015  ;;  %v9892_v16 = vpop.permute.xlu1 %1023 }
 0x23e   : > { %v1095_v29 = vcombine.low %v9689_v45, %v9890_v15  ;;  %v1111_v37 = vcombine.low %v9859_v3, %v9892_v16  ;;  %v1112_v14 = vcombine.high %v9859_v3, %v9892_v16 }
 0x23f   : > { %1697 = vrot.lane.b32.xlu1 %v9611_v36, %s9333_s6 }
 0x240   : > { %v1103_v21 = vrot.slane %v1095_v29, %v9829_v13  ;;  %v1119_v51 = vrot.slane %v1111_v37, %v9829_v13  ;;  %v9958_v29 = vrot.slane %v728_v7, %v9829_v13  ;;  %v743_v7 = vcombine.low %v9721_v53, %v9729_v55 }
 0x241   : > { %v1032_v38 = vpop.permute.xlu0 %1031  ;;  %v1040_v42 = vpop.permute.xlu1 %1039 }
 0x242   : > { %v1159_v44 = vcombine.low %v1103_v21, %v1119_v51  ;;  %v1160_v20 = vcombine.high %v1103_v21, %v1119_v51 }
 0x245   : > { %v1048_v43 = vpop.permute.xlu0 %1047  ;;  %v1056_v24 = vpop.permute.xlu1 %1055 }
 0x246   : > { %v1127_v22 = vcombine.low %v1032_v38, %v1048_v43  ;;  %v1143_v37 = vcombine.low %v1040_v42, %v1056_v24  ;;  %v1128_v40 = vcombine.high %v1032_v38, %v1048_v43  ;;  %v1144_v4 = vcombine.high %v1040_v42, %v1056_v24 }
 0x247   : > { %v744_v38 = vcombine.high %v9721_v53, %v9729_v55  ;;  %v759_v42 = vcombine.low %v9725_v54, %v9735_v56  ;;  %v1096_v43 = vcombine.high %v9689_v45, %v9890_v15  ;;  %v1167_v45 = vrot.slane %v1159_v44, %v9851_v28 }
 0x248   : > { %v1135_v41 = vrot.slane %v1127_v22, %v9829_v13  ;;  %v1151_v6 = vrot.slane %v1143_v37, %v9829_v13  ;;  %v760_v37 = vcombine.high %v9725_v54, %v9735_v56  ;;  %v1142_v26 = vrot.slane %v1128_v40, %v9829_v13 }
 0x249   : > { %v9971_v25 = vpop.permute.xlu0 %1001  ;;  %v9981_v47 = vpop.permute.xlu1 %1009  ;;  %v1158_v53 = vrot.slane %v1144_v4, %v9829_v13  ;;  %v751_v54 = vrot.slane %v743_v7, %v9829_v13  ;;  %v10000_v56 = vrot.slane %v744_v38, %v9829_v13  ;;  %v1110_v40 = vrot.slane %v1096_v43, %v9829_v13 }
 0x24a   : > { %v1191_v22 = vcombine.low %v1135_v41, %v1151_v6  ;;  %v1192_v24 = vcombine.high %v1135_v41, %v1151_v6  ;;  %v1126_v41 = vrot.slane %v1112_v14, %v9829_v13  ;;  %v1174_v6 = vrot.slane %v1160_v20, %v9851_v28 }
 0x24b   : > { %v10012_v7 = vrot.slane %v759_v42, %v9829_v13  ;;  %v10015_v38 = vrot.slane %v760_v37, %v9829_v13  ;;  %v1208_v51 = vcombine.high %v1142_v26, %v1158_v53  ;;  %v791_v42 = vcombine.low %v9955_v50, %v751_v54 }
 0x24c   : > { %v1199_v15 = vrot.slane %v1191_v22, %v9851_v28  ;;  %v1206_v3 = vrot.slane %v1192_v24, %v9851_v28  ;;  %v1207_v22 = vcombine.low %v1142_v26, %v1158_v53  ;;  %v792_v37 = vcombine.high %v9955_v50, %v751_v54 }
 0x24d   : > { %v9993_v23 = vpop.permute.xlu0 %1017  ;;  %v10002_v21 = vpop.permute.xlu1 %1025  ;;  %v1175_v24 = vcombine.low %v1110_v40, %v1126_v41  ;;  %v1176_v55 = vcombine.high %v1110_v40, %v1126_v41  ;;  %v807_v50 = vcombine.low %v9958_v29, %v10000_v56  ;;  %v808_v54 = vcombine.high %v9958_v29, %v10000_v56 }
 0x24e   : > { %v1223_v4 = vcombine.low %v1167_v45, %v1199_v15  ;;  %v1231_v44 = vcombine.low %v9971_v25, %v9993_v23  ;;  %v1247_v43 = vcombine.low %v9981_v47, %v10002_v21  ;;  %v1225_v14 = vcombine.low %v1174_v6, %v1206_v3 }
 0x24f   : > { %v11597_v53 = vcombine.low %v9874_v11, %v9866_v8  ;;  %v1226_v29 = vcombine.high %v1174_v6, %v1206_v3  ;;  %v775_v3 = vcombine.low %v9737_v57, %v9745_v59  ;;  %v776_v6 = vcombine.high %v9737_v57, %v9745_v59 }
 0x250   : > { %8570 = vmatpush3.xpose.msk.msra.mxu0 %vm2271_vm2, %v1223_v4  ;;  %v1224_v4 = vcombine.high %v1167_v45, %v1199_v15  ;;  %8580 = vmatpush3.xpose.msk.msra.mxu1 %vm2271_vm2, %v1225_v14  ;;  %v11598_v45 = vmov 0.0   ;;  %v10051_v15 = vrot.slane %v1208_v51, %v9851_v28  ;;  %v10054_v40 = vrot.slane %v1231_v44, %v9829_v13 }
 0x251   : > { %v10024_v20 = vpop.permute.xlu0 %1033  ;;  %v10028_v16 = vpop.permute.xlu1 %1041  ;;  %8574 = vmatprep.subr.mxu0 %v11553_v0  ;;  %v10043_v0 = vrot.slane %v1207_v22, %v9851_v28  ;;  %8584 = vmatprep.subr.mxu1 %v11598_v45  ;;  %v10057_v41 = vrot.slane %v1247_v43, %v9829_v13  ;;  %v10061_v22 = vrot.slane %v791_v42, %v9851_v28 }
 0x252   : > { %v10064_v14 = vrot.slane %v792_v37, %v9851_v28  ;;  %v11599_v51 = vcombine.low %v9895_v17, %v9871_v10  ;;  %v1183_v43 = vrot.slane %v1175_v24, %v9851_v28  ;;  %v10079_v42 = vrot.slane %v1176_v55, %v9851_v28 }
 0x253   : > { %8572 = vmatmul.mubr.msk.f32.vlgmr.msra.gmra.mrb[8].mxu0 %vm2271_vm2, %v11597_v53  ;;  %v10083_v37 = vrot.slane %v807_v50, %v9851_v28  ;;  %v1295_v55 = vcombine.low %v10054_v40, %v10057_v41  ;;  %v11600_v24 = vcombine.high %v9874_v11, %v9866_v8  ;;  %v10114_v11 = vrot.slane %v808_v54, %v9851_v28 }
 0x254   : > { %8575 = vmatpush3.xpose.msk.msra.mxu0 %vm2271_vm2, %v1224_v4  ;;  %8582 = vmatmul.mubr.msk.f32.vlgmr.msra.gmra.mrb[0].mxu1 %vm2271_vm2, %v11599_v51  ;;  %v879_v4 = vcombine.low %v9743_v58, %v9753_v61  ;;  %v1227_v57 = vcombine.low %v1183_v43, %v10043_v0  ;;  %v1230_v59 = vcombine.high %v10079_v42, %v10051_v15 }
 0x255   : > { %v1050_v56 = vpop.permute.xlu0 %1049  ;;  %v1058_v53 = vpop.permute.xlu1 %1057  ;;  %8576 = vmatprep.mubr.msk.f32.mxu0 %vm9336_vm1, %v11598_v45  ;;  %8585 = vmatpush3.xpose.msk.msra.mxu1 %vm2271_vm2, %v1226_v29  ;;  %v880_v10 = vcombine.high %v9743_v58, %v9753_v61  ;;  %v1248_v17 = vcombine.high %v9981_v47, %v10002_v21  ;;  %v1228_v54 = vcombine.high %v1183_v43, %v10043_v0 }
 0x256   : > { %v1263_v44 = vcombine.low %v10024_v20, %v1050_v56  ;;  %v1279_v49 = vcombine.low %v10028_v16, %v1058_v53  ;;  %8586 = vmatprep.mubr.msk.f32.mxu1 %vm9336_vm1, %v11598_v45  ;;  %8589 = vmatprep.subr.mxu1 %v11598_v45  ;;  %v1264_v29 = vcombine.high %v10024_v20, %v1050_v56 }
 0x257   : > { %8577 = vmatmul.mubr.msk.f32.vlgmr.msra.gmra.mrb[10].mxu0 %vm2271_vm2, %v11600_v24  ;;  %8604 = vmatprep.subr.mxu0 %v11598_v45  ;;  %v783_v24 = vrot.slane %v775_v3, %v9829_v13  ;;  %v790_v20 = vrot.slane %v776_v6, %v9829_v13  ;;  %v10133_v56 = vrot.slane %v1295_v55, %v9851_v28 }
 0x258   : > { %v1271_v51 = vrot.slane %v1263_v44, %v9829_v13  ;;  %v1280_v44 = vcombine.high %v10028_v16, %v1058_v53  ;;  %v1287_v26 = vrot.slane %v1279_v49, %v9829_v13  ;;  %8587 = vmatmul.mubr.msk.f32.vlgmr.msra.gmra.mrb[2].mxu1 %vm2271_vm2, %v11601_v32  ;;  %8605 = vmatpush3.xpose.msk.msra.mxu0 %vm2271_vm2, %v1230_v59 }
 0x259   : > { %v10101_v50 = vpop.permute.xlu0 %1003  ;;  %v10111_v8 = vpop.permute.xlu1 %1011  ;;  %8590 = vmatpush3.xpose.msk.msra.mxu1 %vm2271_vm2, %v1227_v57  ;;  %v1232_v32 = vcombine.high %v9971_v25, %v9993_v23  ;;  %8591 = vmatprep.mubr.msk.f32.mxu1 %vm9336_vm1, %v11598_v45  ;;  %v10129_v16 = vrot.slane %v879_v4, %v9829_v13  ;;  %v10141_v61 = vrot.slane %v1264_v29, %v9829_v13 }
 0x25a   : > { %v1327_v49 = vcombine.low %v1271_v51, %v1287_v26  ;;  %8606 = vmatprep.mubr.msk.f32.mxu0 %vm9336_vm1, %v11598_v45  ;;  %8594 = vmatprep.subr.mxu1 %v11598_v45  ;;  %v10144_v23 = vrot.slane %v1280_v44, %v9829_v13  ;;  %v1328_v25 = vcombine.high %v1271_v51, %v1287_v26 }
 0x25b   : > { %v11602_v0 = vcombine.low %v9884_v31, %v9877_v12  ;;  %v823_v53 = vcombine.low %v10012_v7, %v783_v24  ;;  %v824_v3 = vcombine.high %v10012_v7, %v783_v24  ;;  %v839_v6 = vcombine.low %v10015_v38, %v790_v20  ;;  %8614 = vmatprep.subr.mxu0 %v11598_v45 }
 0x25c   : > { %v1335_v47 = vrot.slane %v1327_v49, %v9851_v28  ;;  %v11603_v43 = vcombine.high %v9898_v18, %v9901_v19  ;;  %v10162_v26 = vrot.slane %v1232_v32, %v9829_v13  ;;  %v10165_v4 = vrot.slane %v1248_v17, %v9829_v13 }
 0x25d   : > { %v10138_v58 = vpop.permute.xlu0 %1019  ;;  %8592 = vmatmul.mubr.msk.f32.vlgmr.msra.gmra.mrb[4].mxu1 %vm2271_vm2, %v11602_v0  ;;  %v10151_v21 = vpop.permute.xlu1 %1027  ;;  %v1296_v51 = vcombine.high %v10054_v40, %v10057_v41  ;;  %v840_v57 = vcombine.high %v10015_v38, %v790_v20  ;;  %v863_v59 = vcombine.low %v9605_v35, %v9751_v60  ;;  %v10176_v55 = vrot.slane %v880_v10, %v9829_v13 }
 0x25e   : > { %8607 = vmatmul.mubr.msk.f32.vlgmr.msra.gmra.mrb[12].mxu0 %vm2271_vm2, %v11603_v43  ;;  %8595 = vmatpush3.xpose.msk.msra.mxu1 %vm2271_vm2, %v1228_v54  ;;  %v1360_v7 = vcombine.high %v10133_v56, %v1335_v47  ;;  %v1229_v29 = vcombine.low %v10079_v42, %v10051_v15  ;;  %v864_v40 = vcombine.high %v9605_v35, %v9751_v60 }
 0x25f   : > { %8596 = vmatprep.mubr.msk.f32.mxu1 %vm9336_vm1, %v11598_v45  ;;  %8599 = vmatprep.subr.mxu1 %v11598_v45  ;;  %v1342_v41 = vrot.slane %v1328_v25, %v9851_v28  ;;  %v1343_v38 = vcombine.low %v10141_v61, %v10144_v23  ;;  %v1367_v24 = vcombine.low %v10101_v50, %v10138_v58 }
 0x260   : > { %v11604_v20 = vcombine.high %v9884_v31, %v9877_v12  ;;  %v10197_v42 = vrot.slane %v823_v53, %v9851_v28  ;;  %v10200_v35 = vrot.slane %v824_v3, %v9851_v28  ;;  %v1383_v60 = vcombine.low %v10111_v8, %v10151_v21  ;;  %8615 = vmatpush3.xpose.msk.msra.mxu0 %vm2271_vm2, %v1360_v7 }
 0x261   : > { %v10181_v44 = vpop.permute.xlu0 %1035  ;;  %v10194_v15 = vpop.permute.xlu1 %1043  ;;  %v10207_v10 = vrot.slane %v839_v6, %v9851_v28  ;;  %v1310_v12 = vrot.slane %v1296_v51, %v9851_v28  ;;  %v1311_v31 = vcombine.low %v10162_v26, %v10165_v4  ;;  %v10216_v32 = vrot.slane %v840_v57, %v9851_v28  ;;  %8616 = vmatprep.mubr.msk.f32.mxu0 %vm9336_vm1, %v11598_v45 }
 0x262   : > { %8597 = vmatmul.mubr.msk.f32.vlgmr.msra.gmra.mrb[6].mxu1 %vm2271_vm2, %v11604_v20  ;;  %v10219_v17 = vrot.slane %v863_v59, %v9829_v13  ;;  %v1344_v49 = vcombine.high %v10141_v61, %v10144_v23  ;;  %v10227_v25 = vrot.slane %v1343_v38, %v9851_v28  ;;  %v1359_v0 = vcombine.low %v10133_v56, %v1335_v47 }
 0x263   : > { %8600 = vmatpush3.xpose.msk.msra.mxu1 %vm2271_vm2, %v1229_v29  ;;  %8601 = vmatprep.mubr.msk.f32.mxu1 %vm9336_vm1, %v11598_v45  ;;  %v1362_v53 = vcombine.high %v1310_v12, %v1342_v41  ;;  %v10231_v3 = vrot.slane %v1367_v24, %v9829_v13  ;;  %v11605_v6 = vcombine.low %v9898_v18, %v9901_v19 }
 0x264   : > { %8609 = vmatprep.subr.mxu1 %v11598_v45  ;;  %v10238_v23 = vrot.slane %v1383_v60, %v9829_v13  ;;  %v11606_v43 = vcombine.high %v9934_v9, %v9952_v48  ;;  %8624 = vmatprep.subr.mxu0 %v11598_v45  ;;  %v10248_v51 = vrot.slane %v864_v40, %v9829_v13 }
 0x265   : > { %v1052_v54 = vpop.permute.xlu0 %1051  ;;  %v1060_v61 = vpop.permute.xlu1 %1059  ;;  %v911_v18 = vcombine.low %v9765_v63, %v9773_v2  ;;  %v1319_v19 = vrot.slane %v1311_v31, %v9851_v28  ;;  %v1312_v7 = vcombine.high %v10162_v26, %v10165_v4  ;;  %v912_v40 = vcombine.high %v9765_v63, %v9773_v2 }
 0x266   : > { %8602 = vmatmul.mubr.msk.f32.vlgmr.msra.gmra.mrb[8].mxu1 %vm2271_vm2, %v11605_v6  ;;  %8617 = vmatmul.mubr.msk.f32.vlgmr.msra.gmra.mrb[14].mxu0 %vm2271_vm2, %v11606_v43  ;;  %v1399_v56 = vcombine.low %v10181_v44, %v1052_v54  ;;  %v1415_v47 = vcombine.low %v10194_v15, %v1060_v61  ;;  %v1361_v38 = vcombine.low %v1310_v12, %v1342_v41 }
 0x267   : > { %8610 = vmatpush3.xpose.msk.msra.mxu1 %vm2271_vm2, %v1359_v0  ;;  %8625 = vmatpush3.xpose.msk.msra.mxu0 %vm2271_vm2, %v1362_v53  ;;  %v1364_v24 = vcombine.high %v1319_v19, %v10227_v25  ;;  %v1358_v4 = vrot.slane %v1344_v49, %v9851_v28  ;;  %v1431_v20 = vcombine.low %v10231_v3, %v10238_v23 }
 0x268   : > { %v1407_v57 = vrot.slane %v1399_v56, %v9829_v13  ;;  %v1423_v59 = vrot.slane %v1415_v47, %v9829_v13  ;;  %8611 = vmatprep.mubr.msk.f32.mxu1 %vm9336_vm1, %v11598_v45  ;;  %8626 = vmatprep.mubr.msk.f32.mxu0 %vm9336_vm1, %v11598_v45  ;;  %v11607_v31 = vcombine.low %v9934_v9, %v9952_v48 }
 0x269   : > { %v10263_v29 = vpop.permute.xlu0 %1005  ;;  %8619 = vmatprep.subr.mxu1 %v11598_v45  ;;  %8634 = vmatprep.subr.mxu0 %v11598_v45  ;;  %v10270_v26 = vpop.permute.xlu1 %1013  ;;  %v11608_v63 = vcombine.high %v9943_v27, %v9961_v39  ;;  %v1368_v2 = vcombine.high %v10101_v50, %v10138_v58  ;;  %v1400_v41 = vcombine.high %v10181_v44, %v1052_v54 }
 0x26a   : > { %v1463_v60 = vcombine.low %v1407_v57, %v1423_v59  ;;  %8612 = vmatmul.mubr.msk.f32.vlgmr.msra.gmra.mrb[10].mxu1 %vm2271_vm2, %v11607_v31  ;;  %v1416_v12 = vcombine.high %v10194_v15, %v1060_v61  ;;  %v1326_v9 = vrot.slane %v1312_v7, %v9851_v28  ;;  %v1384_v48 = vcombine.high %v10111_v8, %v10151_v21 }
 0x26b   : > { %8627 = vmatmul.mubr.msk.f32.vlgmr.msra.gmra.mrb[16].mxu0 %vm2271_vm2, %v11608_v63  ;;  %8620 = vmatpush3.xpose.msk.msra.mxu1 %vm2271_vm2, %v1361_v38  ;;  %v927_v58 = vcombine.low %v10219_v17, %v10129_v16  ;;  %v856_v8 = vcombine.high %v10061_v22, %v10197_v42  ;;  %v855_v21 = vcombine.low %v10061_v22, %v10197_v42 }
 0x26c   : > { %8635 = vmatpush3.xpose.msk.msra.mxu0 %vm2271_vm2, %v1364_v24  ;;  %v10293_v49 = vrot.slane %v1463_v60, %v9851_v28  ;;  %8621 = vmatprep.mubr.msk.f32.mxu1 %vm9336_vm1, %v11598_v45  ;;  %v1363_v15 = vcombine.low %v1319_v19, %v10227_v25  ;;  %v1366_v54 = vcombine.high %v1326_v9, %v1358_v4 }
 0x26d   : > { %8636 = vmatprep.mubr.msk.f32.mxu0 %vm9336_vm1, %v11598_v45  ;;  %v10299_v50 = vpop.permute.xlu0 %1021  ;;  %8629 = vmatprep.subr.mxu1 %v11598_v45  ;;  %v10305_v44 = vpop.permute.xlu1 %1029  ;;  %v1439_v0 = vrot.slane %v1431_v20, %v9851_v28  ;;  %v1464_v53 = vcombine.high %v1407_v57, %v1423_v59  ;;  %v11609_v6 = vcombine.low %v9943_v27, %v9961_v39 }
 0x26e   : > { %8644 = vmatprep.subr.mxu0 %v11598_v45  ;;  %v928_v61 = vcombine.high %v10219_v17, %v10129_v16  ;;  %v10320_v43 = vrot.slane %v1368_v2, %v9829_v13  ;;  %v10323_v56 = vrot.slane %v1400_v41, %v9829_v13  ;;  %v10326_v25 = vrot.slane %v1416_v12, %v9829_v13 }
 0x26f   : > { %8622 = vmatmul.mubr.msk.f32.vlgmr.msra.gmra.mrb[12].mxu1 %vm2271_vm2, %v11609_v6  ;;  %v11610_v47 = vcombine.high %v9946_v33, %v9965_v46  ;;  %v10333_v27 = vrot.slane %v1384_v48, %v9829_v13  ;;  %v1432_v39 = vcombine.high %v10231_v3, %v10238_v23  ;;  %v1496_v16 = vcombine.high %v1439_v0, %v10293_v49 }
 0x270   : > { %8630 = vmatpush3.xpose.msk.msra.mxu1 %vm2271_vm2, %v1363_v15  ;;  %v943_v19 = vcombine.low %v10248_v51, %v10176_v55  ;;  %v10345_v7 = vrot.slane %v911_v18, %v9829_v13  ;;  %v10348_v57 = vrot.slane %v912_v40, %v9829_v13  ;;  %8631 = vmatprep.mubr.msk.f32.mxu1 %vm9336_vm1, %v11598_v45 }
 0x271   : > { %8637 = vmatmul.mubr.msk.f32.vlgmr.msra.gmra.mrb[18].mxu0 %vm2271_vm2, %v11610_v47  ;;  %v10340_v17 = vpop.permute.xlu0 %1037  ;;  %v10354_v3 = vpop.permute.xlu1 %1045  ;;  %v1365_v23 = vcombine.low %v1326_v9, %v1358_v4  ;;  %v1478_v59 = vrot.slane %v1464_v53, %v9851_v28  ;;  %8639 = vmatprep.subr.mxu1 %v11598_v45  ;;  %v858_v18 = vcombine.high %v10064_v14, %v10200_v35 }
 0x272   : > { %8645 = vmatpush3.xpose.msk.msra.mxu0 %vm2271_vm2, %v1366_v54  ;;  %8646 = vmatprep.mubr.msk.f32.mxu0 %vm9336_vm1, %v11598_v45  ;;  %v895_v40 = vcombine.low %v9761_v62, %v9771_v1  ;;  %v1479_v38 = vcombine.low %v10323_v56, %v10326_v25  ;;  %v11611_v24 = vcombine.low %v9946_v33, %v9965_v46 }
 0x273   : > { %8654 = vmatprep.subr.mxu0 %v11598_v45  ;;  %v11612_v4 = vcombine.high %v9949_v52, %v9968_v5  ;;  %v857_v20 = vcombine.low %v10064_v14, %v10200_v35  ;;  %v10376_v60 = vrot.slane %v927_v58, %v9851_v28  ;;  %v1446_v31 = vrot.slane %v1432_v39, %v9851_v28 }
 0x274   : > { %8632 = vmatmul.mubr.msk.f32.vlgmr.msra.gmra.mrb[14].mxu1 %vm2271_vm2, %v11611_v24  ;;  %v1447_v63 = vcombine.low %v10320_v43, %v10333_v27  ;;  %v1503_v33 = vcombine.low %v10263_v29, %v10299_v50  ;;  %v1519_v2 = vcombine.low %v10270_v26, %v10305_v44  ;;  %v10398_v9 = vrot.slane %v928_v61, %v9851_v28 }
 0x275   : > { %8647 = vmatmul.mubr.msk.f32.vlgmr.msra.gmra.mrb[20].mxu0 %vm2271_vm2, %v11612_v4  ;;  %8640 = vmatpush3.xpose.msk.msra.mxu1 %vm2271_vm2, %v1365_v23  ;;  %v10383_v46 = vpop.permute.xlu0 %1053  ;;  %v10395_v12 = vpop.permute.xlu1 %1061  ;;  %v1495_v48 = vcombine.low %v1439_v0, %v10293_v49  ;;  %v1498_v58 = vcombine.high %v1446_v31, %v1478_v59  ;;  %v896_v15 = vcombine.high %v9761_v62, %v9771_v1 }
 0x276   : > { %8655 = vmatpush3.xpose.msk.msra.mxu0 %vm2271_vm2, %v1496_v16  ;;  %8641 = vmatprep.mubr.msk.f32.mxu1 %vm9336_vm1, %v11598_v45  ;;  %v1535_v41 = vcombine.low %v10340_v17, %v10383_v46  ;;  %v10406_v54 = vrot.slane %v895_v40, %v9829_v13  ;;  %v1487_v53 = vrot.slane %v1479_v38, %v9851_v28 }
 0x277   : > { %8656 = vmatprep.mubr.msk.f32.mxu0 %vm9336_vm1, %v11598_v45  ;;  %8649 = vmatprep.subr.mxu1 %v11598_v45  ;;  %v11613_v6 = vcombine.low %v9949_v52, %v9968_v5  ;;  %v1480_v49 = vcombine.high %v10323_v56, %v10326_v25  ;;  %v1551_v1 = vcombine.low %v10354_v3, %v10395_v12 }
 0x278   : > { %8664 = vmatprep.subr.mxu0 %v11598_v45  ;;  %v10419_v62 = vrot.slane %v1535_v41, %v9829_v13  ;;  %v1455_v52 = vrot.slane %v1447_v63, %v9851_v28  ;;  %v10427_v5 = vrot.slane %v1503_v33, %v9829_v13  ;;  %v1448_v56 = vcombine.high %v10320_v43, %v10333_v27 }
 0x279   : > { %8642 = vmatmul.mubr.msk.f32.vlgmr.msra.gmra.mrb[16].mxu1 %vm2271_vm2, %v11613_v6  ;;  %8657 = vmatmul.mubr.msk.f32.vlgmr.msra.gmra.mrb[22].mxu0 %vm2271_vm2, %v856_v8  ;;  %v10423_v0 = vpop.permute.xlu0 %1655  ;;  %v10430_v8 = vrot.slane %v1519_v2, %v9829_v13  ;;  %v10436_v61 = vpop.permute.xlu1 %1643  ;;  %v1497_v25 = vcombine.low %v1446_v31, %v1478_v59  ;;  %v1559_v47 = vrot.slane %v1551_v1, %v9829_v13 }
 0x27a   : > { %8650 = vmatpush3.xpose.msk.msra.mxu1 %vm2271_vm2, %v1495_v48  ;;  %8665 = vmatpush3.xpose.msk.msra.mxu0 %vm2271_vm2, %v1498_v58  ;;  %v1500_v39 = vcombine.high %v1455_v52, %v1487_v53  ;;  %v860_v16 = vcombine.high %v10083_v37, %v10207_v10  ;;  %v859_v43 = vcombine.low %v10083_v37, %v10207_v10 }
 0x27b   : > { %8651 = vmatprep.mubr.msk.f32.mxu1 %vm9336_vm1, %v11598_v45  ;;  %8666 = vmatprep.mubr.msk.f32.mxu0 %vm9336_vm1, %v11598_v45  ;;  %v959_v27 = vcombine.low %v10406_v54, %v10345_v7  ;;  %v1494_v23 = vrot.slane %v1480_v49, %v9851_v28  ;;  %v1599_v59 = vcombine.low %v10419_v62, %v1559_v47 }
 0x27c   : > { %8659 = vmatprep.subr.mxu1 %v11598_v45  ;;  %8674 = vmatprep.subr.mxu0 %v11598_v45  ;;  %v862_v42 = vcombine.high %v10114_v11, %v10216_v32  ;;  %v1536_v37 = vcombine.high %v10340_v17, %v10383_v46  ;;  %v1552_v10 = vcombine.high %v10354_v3, %v10395_v12 }
 0x27d   : > { %8652 = vmatmul.mubr.msk.f32.vlgmr.msra.gmra.mrb[18].mxu1 %vm2271_vm2, %v855_v21  ;;  %8667 = vmatmul.mubr.msk.f32.vlgmr.msra.gmra.mrb[24].mxu0 %vm2271_vm2, %v858_v18  ;;  %v10457_v22 = vpop.permute.xlu0 %1691  ;;  %v1567_v21 = vcombine.low %v10427_v5, %v10430_v8  ;;  %v10470_v18 = vpop.permute.xlu1 %1667  ;;  %v10473_v40 = vrot.slane %v896_v15, %v9829_v13  ;;  %v1462_v38 = vrot.slane %v1448_v56, %v9851_v28 }
 0x27e   : > { %8660 = vmatpush3.xpose.msk.msra.mxu1 %vm2271_vm2, %v1497_v25  ;;  %8675 = vmatpush3.xpose.msk.msra.mxu0 %vm2271_vm2, %v1500_v39  ;;  %v1504_v24 = vcombine.high %v10263_v29, %v10299_v50  ;;  %v1727_v17 = vcombine.low %v9587_v30, %v10423_v0  ;;  %v1520_v3 = vcombine.high %v10270_v26, %v10305_v44 }
 0x27f   : > { %8661 = vmatprep.mubr.msk.f32.mxu1 %vm9336_vm1, %v11598_v45  ;;  %8676 = vmatprep.mubr.msk.f32.mxu0 %vm9336_vm1, %v11598_v45  ;;  %v10485_v4 = vrot.slane %v1599_v59, %v9851_v28  ;;  %v1743_v29 = vcombine.low %v10436_v61, %v10470_v18  ;;  %v960_v50 = vcombine.high %v10406_v54, %v10345_v7 }
 0x280   : > { %8669 = vmatprep.subr.mxu1 %v11598_v45  ;;  %v10497_v31 = vrot.slane %v959_v27, %v9851_v28  ;;  %v1499_v26 = vcombine.low %v1455_v52, %v1487_v53  ;;  %v1502_v44 = vcombine.high %v1462_v38, %v1494_v23  ;;  %v1575_v14 = vrot.slane %v1567_v21, %v9851_v28 }
 0x281   : > { %8662 = vmatmul.mubr.msk.f32.vlgmr.msra.gmra.mrb[20].mxu1 %vm2271_vm2, %v857_v20  ;;  %8677 = vmatmul.mubr.msk.f32.vlgmr.msra.gmra.mrb[26].mxu0 %vm2271_vm2, %v860_v16  ;;  %v10500_v63 = vpop.permute.xlu0 %1715  ;;  %v1550_v35 = vrot.slane %v1536_v37, %v9829_v13  ;;  %v1566_v20 = vrot.slane %v1552_v10, %v9829_v13  ;;  %v1600_v46 = vcombine.high %v10419_v62, %v1559_v47  ;;  %v10507_v7 = vpop.permute.xlu1 %1679 }
 0x282   : > { %8684 = vmatprep.subr.mxu0 %v11598_v45  ;;  %v10510_v33 = vrot.slane %v1504_v24, %v9829_v13  ;;  %v10513_v2 = vrot.slane %v1727_v17, %v9829_v13  ;;  %8670 = vmatpush3.xpose.msk.msra.mxu1 %vm2271_vm2, %v1499_v26  ;;  %v10518_v41 = vrot.slane %v1743_v29, %v9829_v13 }
 0x283   : > { %8685 = vmatpush3.xpose.msk.msra.mxu0 %vm2271_vm2, %v1502_v44  ;;  %v10521_v12 = vrot.slane %v1520_v3, %v9829_v13  ;;  %v1568_v48 = vcombine.high %v10427_v5, %v10430_v8  ;;  %v1632_v58 = vcombine.high %v1575_v14, %v10485_v4  ;;  %8671 = vmatprep.mubr.msk.f32.mxu1 %vm9336_vm1, %v11598_v45 }
 0x284   : > { %8686 = vmatprep.mubr.msk.f32.mxu0 %vm9336_vm1, %v11598_v45  ;;  %v1501_v15 = vcombine.low %v1462_v38, %v1494_v23  ;;  %v1792_v54 = vcombine.high %v10513_v2, %v10518_v41  ;;  %8679 = vmatprep.subr.mxu1 %v11598_v45  ;;  %v1775_v53 = vcombine.low %v10457_v22, %v10500_v63 }
 0x285   : > { %v861_v6 = vcombine.low %v10114_v11, %v10216_v32  ;;  %v10537_v49 = vpop.permute.xlu0 %1645  ;;  %v975_v62 = vcombine.low %v10473_v40, %v10348_v57  ;;  %v1614_v1 = vrot.slane %v1600_v46, %v9851_v28  ;;  %v1615_v52 = vcombine.low %v1550_v35, %v1566_v20  ;;  %8672 = vmatmul.mubr.msk.f32.vlgmr.msra.gmra.mrb[22].mxu1 %vm2271_vm2, %v859_v43  ;;  %v10544_v5 = vpop.permute.xlu1 %1703 }
 0x286   : > { %11614 = vst [vmem:[#allocation13_spill] sm:$0xff] %v10537_v49  ;;  %8687 = vmatmul.mubr.msk.f32.vlgmr.msra.gmra.mrb[28].mxu0 %vm2271_vm2, %v862_v42  ;;  %v974_v8 = vrot.slane %v960_v50, %v9851_v28  ;;  %8694 = vmatprep.subr.mxu0 %v11598_v45  ;;  %v992_v11 = vcombine.high %v10376_v60, %v10497_v31 }
 0x287   : > { %8680 = vmatpush3.xpose.msk.msra.mxu1 %vm2271_vm2, %v1501_v15  ;;  %v1759_v32 = vcombine.low %v10507_v7, %v10544_v5  ;;  %v1582_v56 = vrot.slane %v1568_v48, %v9851_v28  ;;  %v1583_v25 = vcombine.low %v10510_v33, %v10521_v12  ;;  %v1616_v47 = vcombine.high %v1550_v35, %v1566_v20 }
 0x288   : > { %8695 = vmatpush3.xpose.msk.msra.mxu0 %vm2271_vm2, %v1632_v58  ;;  %8681 = vmatprep.mubr.msk.f32.mxu1 %vm9336_vm1, %v11598_v45  ;;  %v1631_v39 = vcombine.low %v1575_v14, %v10485_v4  ;;  %v1783_v16 = vrot.slane %v1775_v53, %v9829_v13  ;;  %v976_v27 = vcombine.high %v10473_v40, %v10348_v57 }
 0x289   : > { %8696 = vmatprep.mubr.msk.f32.mxu0 %vm9336_vm1, %v11598_v45  ;;  %8689 = vmatprep.subr.mxu1 %v11598_v45  ;;  %v1767_v43 = vrot.slane %v1759_v32, %v9829_v13  ;;  %v1623_v23 = vrot.slane %v1615_v52, %v9851_v28  ;;  %v1634_v59 = vcombine.high %v1582_v56, %v1614_v1  ;;  %v10570_v42 = vpop.permute.xlu0 %1681  ;;  %v10572_v21 = vpop.permute.xlu1 %1657 }
 0x28a   : > { %8682 = vmatmul.mubr.msk.f32.vlgmr.msra.gmra.mrb[24].mxu1 %vm2271_vm2, %v861_v6  ;;  %8704 = vmatprep.subr.mxu0 %v11598_v45  ;;  %11615 = vst [vmem:[#allocation14_spill] sm:$0xff] %v10572_v21  ;;  %v983_v37 = vrot.slane %v975_v62, %v9851_v28  ;;  %v991_v57 = vcombine.low %v10376_v60, %v10497_v31 }
 0x28b   : > { %8697 = vmatmul.mubr.msk.f32.vlgmr.msra.gmra.mrb[30].mxu0 %vm2271_vm2, %v992_v11  ;;  %8690 = vmatpush3.xpose.msk.msra.mxu1 %vm2271_vm2, %v1631_v39  ;;  %v1824_v10 = vcombine.high %v1767_v43, %v1783_v16  ;;  %v1584_v40 = vcombine.high %v10510_v33, %v10521_v12  ;;  %v1591_v38 = vrot.slane %v1583_v25, %v9851_v28 }
 0x28c   : > { %8705 = vmatpush3.xpose.msk.msra.mxu0 %vm2271_vm2, %v1634_v59  ;;  %v1823_v24 = vcombine.low %v1767_v43, %v1783_v16  ;;  %8691 = vmatprep.mubr.msk.f32.mxu1 %vm9336_vm1, %v11598_v45  ;;  %v1630_v17 = vrot.slane %v1616_v47, %v9851_v28  ;;  %v1633_v3 = vcombine.low %v1582_v56, %v1614_v1 }
 0x28d   : > { %8706 = vmatprep.mubr.msk.f32.mxu0 %vm9336_vm1, %v11598_v45  ;;  %8699 = vmatprep.subr.mxu1 %v11598_v45  ;;  %v994_v60 = vcombine.high %v10398_v9, %v974_v8  ;;  %v1636_v4 = vcombine.high %v1591_v38, %v1623_v23  ;;  %v1791_v29 = vcombine.low %v10513_v2, %v10518_v41  ;;  %v10594_v50 = vpop.permute.xlu1 %1669  ;;  %v10612_v20 = vpop.permute.xlu0 %1705 }
 0x28e   : > { %8692 = vmatmul.mubr.msk.f32.vlgmr.msra.gmra.mrb[26].mxu1 %vm2271_vm2, %v991_v57  ;;  %8714 = vmatprep.subr.mxu0 %v11598_v45  ;;  %11616 = vst [vmem:[#allocation15_spill] sm:$0xff] %v10594_v50  ;;  %v10597_v31 = vrot.slane %v1824_v10, %v9851_v28  ;;  %v944_v26 = vcombine.high %v10248_v51, %v10176_v55 }
 0x28f   : > { %v951_v44 = vrot.slane %v943_v19, %v9851_v28  ;;  %8707 = vmatmul.mubr.msk.f32.vlgmr.msra.gmra.mrb[32].mxu0 %vm2271_vm2, %v994_v60  ;;  %8700 = vmatpush3.xpose.msk.msra.mxu1 %vm2271_vm2, %v1633_v3  ;;  %v993_v14 = vcombine.low %v10398_v9, %v974_v8  ;;  %v1598_v35 = vrot.slane %v1584_v40, %v9851_v28 }
 0x290   : > { %8715 = vmatpush3.xpose.msk.msra.mxu0 %vm2271_vm2, %v1636_v4  ;;  %8701 = vmatprep.mubr.msk.f32.mxu1 %vm9336_vm1, %v11598_v45  ;;  %v1831_v46 = vrot.slane %v1823_v24, %v9851_v28  ;;  %v10619_v55 = vrot.slane %v1792_v54, %v9851_v28  ;;  %v990_v51 = vrot.slane %v976_v27, %v9851_v28 }
 0x291   : > { %v1635_v19 = vcombine.low %v1591_v38, %v1623_v23  ;;  %8716 = vmatprep.mubr.msk.f32.mxu0 %vm9336_vm1, %v11598_v45  ;;  %8709 = vmatprep.subr.mxu1 %v11598_v45  ;;  %v996_v9 = vcombine.high %v951_v44, %v983_v37  ;;  %v1638_v33 = vcombine.high %v1598_v35, %v1630_v17  ;;  %v10628_v48 = vpop.permute.xlu1 %1693  ;;  %v1660_v62 = vpop.permute.xlu0 %1659 }
 0x292   : > { %8702 = vmatmul.mubr.msk.f32.vlgmr.msra.gmra.mrb[28].mxu1 %vm2271_vm2, %v993_v14  ;;  %8724 = vmatprep.subr.mxu0 %v11598_v45  ;;  %v1799_v12 = vrot.slane %v1791_v29, %v9851_v28  ;;  %v958_v41 = vrot.slane %v944_v26, %v9851_v28  ;;  %v995_v58 = vcombine.low %v951_v44, %v983_v37 }
 0x293   : > { %8717 = vmatmul.mubr.msk.f32.vlgmr.msra.gmra.mrb[34].mxu0 %vm2271_vm2, %v996_v9  ;;  %8710 = vmatpush3.xpose.msk.msra.mxu1 %vm2271_vm2, %v1635_v19  ;;  %v1637_v54 = vcombine.low %v1598_v35, %v1630_v17  ;;  %v1999_v47 = vcombine.low %v9603_v34, %v1660_v62  ;;  %v2000_v27 = vcombine.high %v9603_v34, %v1660_v62 }
 0x294   : > { %8725 = vmatpush3.xpose.msk.msra.mxu0 %vm2271_vm2, %v1638_v33  ;;  %8711 = vmatprep.mubr.msk.f32.mxu1 %vm9336_vm1, %v11598_v45  ;;  %v1856_v15 = vcombine.high %v1799_v12, %v1831_v46  ;;  %v998_v53 = vcombine.high %v958_v41, %v990_v51  ;;  %v997_v52 = vcombine.low %v958_v41, %v990_v51 }
 0x295   : > { %8726 = vmatprep.mubr.msk.f32.mxu0 %vm9336_vm1, %v11598_v45  ;;  %8719 = vmatprep.subr.mxu1 %v11598_v45  ;;  %v10645_v1 = vpop.permute.xlu1 %1717  ;;  %v1855_v8 = vcombine.low %v1799_v12, %v1831_v46  ;;  %v1696_v32 = vpop.permute.xlu0 %1695  ;;  %v2007_v10 = vrot.slane %v1999_v47, %v9829_v13  ;;  %v2014_v17 = vrot.slane %v2000_v27, %v9829_v13 }
 0x296   : > { %8712 = vmatmul.mubr.msk.f32.vlgmr.msra.gmra.mrb[30].mxu1 %vm2271_vm2, %v995_v58  ;;  %8734 = vmatprep.subr.mxu0 %v11598_v45 }
 0x297   : > { %8727 = vmatmul.mubr.msk.f32.vlgmr.msra.gmra.mrb[36].mxu0 %vm2271_vm2, %v998_v53  ;;  %8720 = vmatpush3.xpose.msk.msra.mxu1 %vm2271_vm2, %v1637_v54 }
 0x298   : > { %8735 = vmatpush3.msra.mxu0 %v1856_v15  ;;  %8721 = vmatprep.mubr.msk.f32.mxu1 %vm9336_vm1, %v11598_v45 }
 0x299   : > { %8729 = vmatprep.subr.mxu1 %v11598_v45  ;;  %8736 = vmatprep.mubr.msk.f32.mxu0 %vm9336_vm1, %v11598_v45  ;;  %v1648_v11 = vpop.permute.xlu1 %1647  ;;  %v1720_v39 = vpop.permute.xlu0 %1719 }
 0x29a   : > { %8722 = vmatmul.mubr.msk.f32.vlgmr.msra.gmra.mrb[32].mxu1 %vm2271_vm2, %v997_v52  ;;  %8744 = vmatprep.subr.mxu0 %v11598_v45  ;;  %v2047_v59 = vcombine.low %v1696_v32, %v1720_v39  ;;  %v2048_v37 = vcombine.high %v1696_v32, %v1720_v39 }
 0x29b   : > { %8730 = vmatpush3.msra.mxu1 %v1855_v8  ;;  %8731 = vmatprep.mubr.msk.f32.mxu1 %vm9336_vm1, %v11598_v45 }
 0x29c   : > { %8739 = vmatprep.subr.mxu1 %v11598_v45  ;;  %v2055_v4 = vrot.slane %v2047_v59, %v9829_v13  ;;  %v2062_v29 = vrot.slane %v2048_v37, %v9829_v13 }
 0x29d   : > { %v1672_v56 = vpop.permute.xlu1 %1671  ;;  %v1650_v52 = vpop.permute.xlu0 %1649 }
 0x29e   : > { %v2015_v25 = vcombine.low %v1648_v11, %v1672_v56  ;;  %v2016_v16 = vcombine.high %v1648_v11, %v1672_v56 }
 0x2a0   : > { %v2023_v23 = vrot.slane %v2015_v25, %v9829_v13  ;;  %v2030_v57 = vrot.slane %v2016_v16, %v9829_v13 }
 0x2a1   : > { %v1684_v43 = vpop.permute.xlu1 %1683 }
 0x2a2   : > { %v2063_v3 = vcombine.low %v2007_v10, %v2023_v23  ;;  %v2064_v60 = vcombine.high %v2007_v10, %v2023_v23  ;;  %v2079_v44 = vcombine.low %v2014_v17, %v2030_v57  ;;  %v2080_v14 = vcombine.high %v2014_v17, %v2030_v57 }
 0x2a4   : > { %v10672_v41 = vrot.slane %v2063_v3, %v9851_v28  ;;  %v10675_v58 = vrot.slane %v2064_v60, %v9851_v28  ;;  %v10696_v56 = vrot.slane %v2079_v44, %v9851_v28  ;;  %v10699_v25 = vrot.slane %v2080_v14, %v9851_v28 }
 0x2a5   : > { %v1708_v40 = vpop.permute.xlu1 %1707 }
 0x2a6   : > { %v2031_v38 = vcombine.low %v1684_v43, %v1708_v40  ;;  %v2032_v24 = vcombine.high %v1684_v43, %v1708_v40  ;;  %11617 = vst [vmem:[#allocation16_spill] sm:$0xff] %v10672_v41  ;;  %11618 = vst [vmem:[#allocation17_spill] sm:$0xff] %v10675_v58 }
 0x2a7   : > { %11625 = vst [vmem:[#allocation24_spill] sm:$0xff] %v10696_v56  ;;  %11626 = vst [vmem:[#allocation25_spill] sm:$0xff] %v10699_v25  ;;  %v10859_v56 = vpop.permute.xlu0 %1685 }
 0x2a8   : > { %v2039_v34 = vrot.slane %v2031_v38, %v9829_v13  ;;  %v2046_v26 = vrot.slane %v2032_v24, %v9829_v13  ;;  %11629 = vst [vmem:[#allocation28_spill] sm:$0xff] %v10859_v56 }
 0x2a9   : > { %v1662_v35 = vpop.permute.xlu1 %1661 }
 0x2aa   : > { %v2095_v46 = vcombine.low %v2039_v34, %v2055_v4  ;;  %v2096_v51 = vcombine.high %v2039_v34, %v2055_v4  ;;  %v2111_v19 = vcombine.low %v2046_v26, %v2062_v29  ;;  %v2112_v9 = vcombine.high %v2046_v26, %v2062_v29 }
 0x2ab   : > { %v2135_v33 = vcombine.low %v9611_v36, %v1662_v35  ;;  %v2136_v12 = vcombine.high %v9611_v36, %v1662_v35 }
 0x2ac   : > { %v10678_v15 = vrot.slane %v2095_v46, %v9851_v28  ;;  %v10681_v54 = vrot.slane %v2096_v51, %v9851_v28  ;;  %v10684_v53 = vrot.slane %v2111_v19, %v9851_v28  ;;  %v10687_v62 = vrot.slane %v2112_v9, %v9851_v28 }
 0x2ad   : > { %v10690_v8 = vrot.slane %v2135_v33, %v9829_v13  ;;  %v10693_v11 = vrot.slane %v2136_v12, %v9829_v13  ;;  %v1674_v32 = vpop.permute.xlu1 %1673 }
 0x2ae   : > { %11619 = vst [vmem:[#allocation18_spill] sm:$0xff] %v10678_v15  ;;  %11620 = vst [vmem:[#allocation19_spill] sm:$0xff] %v10681_v54  ;;  %v2151_v47 = vcombine.low %v1650_v52, %v1674_v32  ;;  %v2152_v39 = vcombine.high %v1650_v52, %v1674_v32 }
 0x2af   : > { %11621 = vst [vmem:[#allocation20_spill] sm:$0xff] %v10684_v53  ;;  %11622 = vst [vmem:[#allocation21_spill] sm:$0xff] %v10687_v62 }
 0x2b0   : > { %11623 = vst [vmem:[#allocation22_spill] sm:$0xff] %v10690_v8  ;;  %11624 = vst [vmem:[#allocation23_spill] sm:$0xff] %v10693_v11  ;;  %v10714_v10 = vrot.slane %v2151_v47, %v9829_v13  ;;  %v10717_v57 = vrot.slane %v2152_v39, %v9829_v13 }
 0x2b2   : > { %11627 = vst [vmem:[#allocation26_spill] sm:$0xff] %v10714_v10  ;;  %11628 = vst [vmem:[#allocation27_spill] sm:$0xff] %v10717_v57 }
 0x326   : > { %v10731_v4 = vpop.f32.mrb[8].mxu0 }
 0x327   : > { %v8573_v29 = vpop.f32.mrb[9].mxu0  ;;  %v4704_v34 = vsel %vm2271_vm2, %v10731_v4, -inf  ;;  %v10735_v26 = vpop.f32.mrb[0].mxu1 }
 0x328   : > { %4705 = vmax.xlane.f32.xlu0 %v4704_v34  ;;  %v8583_v44 = vpop.f32.mrb[1].mxu1  ;;  %v4710_v35 = vsel %vm2271_vm2, %v10735_v26, -inf }
 0x32a   : > { %v10737_v14 = vpop.f32.mrb[10].mxu0 }
 0x32b   : > { %v10741_v46 = vpop.f32.mrb[2].mxu1  ;;  %v8578_v51 = vpop.f32.mrb[11].mxu0  ;;  %v4707_v19 = vsel %vm2271_vm2, %v10737_v14, -inf }
 0x32c   : > { %4711 = vmax.xlane.f32.xlu0 %v4710_v35  ;;  %v8588_v9 = vpop.f32.mrb[3].mxu1  ;;  %4708 = vmax.xlane.f32.xlu1 %v4707_v19  ;;  %v4713_v33 = vsel %vm2271_vm2, %v10741_v46, -inf }
 0x330   : > { %v10747_v12 = vpop.f32.mrb[4].mxu1  ;;  %4714 = vmax.xlane.f32.xlu0 %v4713_v33 }
 0x331   : > { %v10749_v52 = vpop.f32.mrb[12].mxu0  ;;  %v8593_v32 = vpop.f32.mrb[5].mxu1  ;;  %v4716_v47 = vsel %vm2271_vm2, %v10747_v12, -inf }
 0x332   : > { %v8608_v39 = vpop.f32.mrb[13].mxu0  ;;  %4717 = vmax.xlane.f32.xlu1 %v4716_v47  ;;  %v4725_v29 = vsel %vm2271_vm2, %v10749_v52, -inf }
 0x334   : > { %4726 = vmax.xlane.f32.xlu0 %v4725_v29 }
 0x335   : > { %v10755_v34 = vpop.f32.mrb[6].mxu1 }
 0x336   : > { %v8598_v44 = vpop.f32.mrb[7].mxu1  ;;  %v4719_v35 = vsel %vm2271_vm2, %v10755_v34, -inf }
 0x338   : > { %4720 = vmax.xlane.f32.xlu0 %v4719_v35 }
 0x339   : > { %v10759_v51 = vpop.f32.mrb[8].mxu1  ;;  %v10761_v19 = vpop.f32.mrb[14].mxu0 }
 0x33a   : > { %v8603_v9 = vpop.f32.mrb[9].mxu1  ;;  %v4722_v33 = vsel %vm2271_vm2, %v10759_v51, -inf  ;;  %v8618_v32 = vpop.f32.mrb[15].mxu0  ;;  %v4731_v47 = vsel %vm2271_vm2, %v10761_v19, -inf }
 0x33b   : > { %4723 = vmax.xlane.f32.xlu1 %v4722_v33 }
 0x33c   : > { %4732 = vmax.xlane.f32.xlu0 %v4731_v47 }
 0x33d   : > { %v10767_v39 = vpop.f32.mrb[10].mxu1 }
 0x33e   : > { %v10769_v29 = vpop.f32.mrb[16].mxu0  ;;  %v8613_v44 = vpop.f32.mrb[11].mxu1  ;;  %v4728_v35 = vsel %vm2271_vm2, %v10767_v39, -inf }
 0x33f   : > { %v8628_v60 = vpop.f32.mrb[17].mxu0  ;;  %4729 = vmax.xlane.f32.xlu1 %v4728_v35  ;;  %v4737_v9 = vsel %vm2271_vm2, %v10769_v29, -inf }
 0x340   : > { %4738 = vmax.xlane.f32.xlu0 %v4737_v9 }
 0x342   : > { %v10775_v32 = vpop.f32.mrb[12].mxu1 }
 0x343   : > { %v8623_v3 = vpop.f32.mrb[13].mxu1  ;;  %v4734_v47 = vsel %vm2271_vm2, %v10775_v32, -inf }
 0x344   : > { %v10777_v33 = vpop.f32.mrb[18].mxu0  ;;  %4735 = vmax.xlane.f32.xlu1 %v4734_v47 }
 0x345   : > { %v8638_v17 = vpop.f32.mrb[19].mxu0  ;;  %v4743_v60 = vsel %vm2271_vm2, %v10777_v33, -inf }
 0x346   : > { %4744 = vmax.xlane.f32.xlu0 %v4743_v60 }
 0x347   : > { %v10783_v44 = vpop.f32.mrb[14].mxu1 }
 0x348   : > { %v10785_v35 = vpop.f32.mrb[20].mxu0  ;;  %v8633_v24 = vpop.f32.mrb[15].mxu1  ;;  %v4740_v38 = vsel %vm2271_vm2, %v10783_v44, -inf }
 0x349   : > { %v8648_v9 = vpop.f32.mrb[21].mxu0  ;;  %v4749_v3 = vsel %vm2271_vm2, %v10785_v35, -inf  ;;  %4741 = vmax.xlane.f32.xlu1 %v4740_v38 }
 0x34a   : > { %4750 = vmax.xlane.f32.xlu0 %v4749_v3 }
 0x34c   : > { %v10791_v17 = vpop.f32.mrb[16].mxu1  ;;  %v10793_v47 = vpop.f32.mrb[22].mxu0 }
 0x34d   : > { %v8643_v40 = vpop.f32.mrb[17].mxu1  ;;  %v8658_v60 = vpop.f32.mrb[23].mxu0  ;;  %v4746_v37 = vsel %vm2271_vm2, %v10791_v17, -inf  ;;  %v4755_v24 = vsel %vm2271_vm2, %v10793_v47, -inf }
 0x34e   : > { %4747 = vmax.xlane.f32.xlu1 %v4746_v37  ;;  %4756 = vmax.xlane.f32.xlu0 %v4755_v24 }
 0x350   : > { %v10799_v9 = vpop.f32.mrb[18].mxu1  ;;  %v10801_v59 = vpop.f32.mrb[24].mxu0 }
 0x351   : > { %v8653_v38 = vpop.f32.mrb[19].mxu1  ;;  %v8668_v3 = vpop.f32.mrb[25].mxu0  ;;  %v4752_v23 = vsel %vm2271_vm2, %v10799_v9, -inf  ;;  %v4761_v40 = vsel %vm2271_vm2, %v10801_v59, -inf }
 0x352   : > { %4753 = vmax.xlane.f32.xlu1 %v4752_v23  ;;  %4762 = vmax.xlane.f32.xlu0 %v4761_v40 }
 0x354   : > { %v10807_v60 = vpop.f32.mrb[20].mxu1  ;;  %v10809_v27 = vpop.f32.mrb[26].mxu0 }
 0x355   : > { %v8663_v37 = vpop.f32.mrb[21].mxu1  ;;  %v4758_v24 = vsel %vm2271_vm2, %v10807_v60, -inf  ;;  %v8678_v43 = vpop.f32.mrb[27].mxu0  ;;  %v4767_v38 = vsel %vm2271_vm2, %v10809_v27, -inf }
 0x356   : > { %4759 = vmax.xlane.f32.xlu1 %v4758_v24  ;;  %4768 = vmax.xlane.f32.xlu0 %v4767_v38 }
 0x358   : > { %v10815_v3 = vpop.f32.mrb[22].mxu1 }
 0x359   : > { %v10817_v16 = vpop.f32.mrb[28].mxu0  ;;  %v8673_v23 = vpop.f32.mrb[23].mxu1  ;;  %v4764_v6 = vsel %vm2271_vm2, %v10815_v3, -inf }
 0x35a   : > { %v8688_v40 = vpop.f32.mrb[29].mxu0  ;;  %v4773_v37 = vsel %vm2271_vm2, %v10817_v16, -inf  ;;  %4765 = vmax.xlane.f32.xlu1 %v4764_v6 }
 0x35b   : > { %4774 = vmax.xlane.f32.xlu0 %v4773_v37 }
 0x35d   : > { %v10823_v43 = vpop.f32.mrb[24].mxu1 }
 0x35e   : > { %v10825_v24 = vpop.f32.mrb[30].mxu0  ;;  %v8683_v2 = vpop.f32.mrb[25].mxu1  ;;  %v4770_v38 = vsel %vm2271_vm2, %v10823_v43, -inf }
 0x35f   : > { %v8698_v57 = vpop.f32.mrb[31].mxu0  ;;  %4771 = vmax.xlane.f32.xlu1 %v4770_v38  ;;  %v4779_v23 = vsel %vm2271_vm2, %v10825_v24, -inf }
 0x360   : > { %4780 = vmax.xlane.f32.xlu0 %v4779_v23 }
 0x361   : > { %v10831_v40 = vpop.f32.mrb[26].mxu1 }
 0x362   : > { %v10833_v11 = vpop.f32.mrb[32].mxu0  ;;  %v8693_v6 = vpop.f32.mrb[27].mxu1  ;;  %v4776_v37 = vsel %vm2271_vm2, %v10831_v40, -inf }
 0x363   : > { %v8708_v10 = vpop.f32.mrb[33].mxu0  ;;  %4777 = vmax.xlane.f32.xlu1 %v4776_v37  ;;  %v4785_v2 = vsel %vm2271_vm2, %v10833_v11, -inf }
 0x364   : > { %4786 = vmax.xlane.f32.xlu0 %v4785_v2 }
 0x365   : > { %v10839_v57 = vpop.f32.mrb[28].mxu1 }
 0x366   : > { %v10841_v38 = vpop.f32.mrb[34].mxu0  ;;  %v8703_v8 = vpop.f32.mrb[29].mxu1  ;;  %v4782_v23 = vsel %vm2271_vm2, %v10839_v57, -inf }
 0x367   : > { %v8718_v62 = vpop.f32.mrb[35].mxu0  ;;  %4783 = vmax.xlane.f32.xlu1 %v4782_v23  ;;  %v4791_v6 = vsel %vm2271_vm2, %v10841_v38, -inf }
 0x368   : > { %4792 = vmax.xlane.f32.xlu0 %v4791_v6 }
 0x369   : > { %v10847_v10 = vpop.f32.mrb[30].mxu1 }
 0x36a   : > { %v10849_v37 = vpop.f32.mrb[36].mxu0  ;;  %v8713_v25 = vpop.f32.mrb[31].mxu1  ;;  %v4788_v2 = vsel %vm2271_vm2, %v10847_v10, -inf }
 0x36b   : > { %v8728_v53 = vpop.f32.mrb[37].mxu0  ;;  %4789 = vmax.xlane.f32.xlu1 %v4788_v2  ;;  %v4797_v8 = vsel %vm2271_vm2, %v10849_v37, -inf  ;;  %v10861_v25 = vpop.permute.xlu1 %1697 }
 0x36c   : > { %4798 = vmax.xlane.f32.xlu0 %v4797_v8  ;;  %11630 = vst [vmem:[#allocation29_spill] sm:$0xff] %v10861_v25 }
 0x36d   : > { %v10855_v62 = vpop.f32.mrb[32].mxu1 }
 0x36e   : > { %v8723_v23 = vpop.f32.mrb[33].mxu1  ;;  %v4794_v6 = vsel %vm2271_vm2, %v10855_v62, -inf }
 0x36f   : > { %4795 = vmax.xlane.f32.xlu1 %v4794_v6 }
 0x3b5   : > { %v4706_v54 = vpop.xlane.xlu0 %4705 }
 0x3b6   : > { %v4800_v58 = vsub.f32 %v10731_v4, %v4706_v54 }
 0x3b8   : > { %v4832_v53 = vmul.f32 1.442695, %v4800_v58 }
 0x3b9   : > { %v4712_v2 = vpop.xlane.xlu0 %4711  ;;  %v4709_v8 = vpop.xlane.xlu1 %4708 }
 0x3ba   : > { %9034 = vpow2.f32 %v4832_v53  ;;  %v4802_v15 = vsub.f32 %v10735_v26, %v4712_v2  ;;  %v4801_v41 = vsub.f32 %v10737_v14, %v4709_v8 }
 0x3bc   : > { %v4836_v23 = vmul.f32 1.442695, %v4802_v15  ;;  %v4834_v21 = vmul.f32 1.442695, %v4801_v41 }
 0x3bd   : > { %v4715_v49 = vpop.xlane.xlu0 %4714 }
 0x3be   : > { %9036 = vpow2.f32 %v4836_v23  ;;  %v4803_v6 = vsub.f32 %v10741_v46, %v4715_v49 }
 0x3bf   : > { %9038 = vpow2.f32 %v4834_v21  ;;  %v4718_v56 = vpop.xlane.xlu1 %4717 }
 0x3c0   : > { %v4838_v50 = vmul.f32 1.442695, %v4803_v6  ;;  %v4804_v25 = vsub.f32 %v10747_v12, %v4718_v56 }
 0x3c1   : > { %v4727_v54 = vpop.xlane.xlu0 %4726 }
 0x3c2   : > { %9040 = vpow2.f32 %v4838_v50  ;;  %v4840_v58 = vmul.f32 1.442695, %v4804_v25  ;;  %v4807_v4 = vsub.f32 %v10749_v52, %v4727_v54 }
 0x3c4   : > { %v10869_v26 = vpop.eup %9034  ;;  %9042 = vpow2.f32 %v4840_v58  ;;  %v4846_v14 = vmul.f32 1.442695, %v4807_v4 }
 0x3c5   : > { %v4721_v15 = vpop.xlane.xlu0 %4720  ;;  %v4896_v41 = vsel %vm2271_vm2, %v10869_v26, 0.0 }
 0x3c6   : > { %9044 = vpow2.f32 %v4846_v14  ;;  %v4805_v49 = vsub.f32 %v10755_v34, %v4721_v15  ;;  %4897 = vadd.xlane.f32.xlu1 %v4896_v41 }
 0x3c8   : > { %v4724_v21 = vpop.xlane.xlu1 %4723  ;;  %v10874_v46 = vpop.eup %9036  ;;  %v4842_v56 = vmul.f32 1.442695, %v4805_v49 }
 0x3c9   : > { %v4806_v50 = vsub.f32 %v10759_v51, %v4724_v21  ;;  %v10877_v12 = vpop.eup %9038  ;;  %v4733_v52 = vpop.xlane.xlu0 %4732  ;;  %v4902_v25 = vsel %vm2271_vm2, %v10874_v46, 0.0 }
 0x3ca   : > { %9046 = vpow2.f32 %v4842_v56  ;;  %v4809_v2 = vsub.f32 %v10761_v19, %v4733_v52  ;;  %4903 = vadd.xlane.f32.xlu1 %v4902_v25  ;;  %v4899_v34 = vsel %vm2271_vm2, %v10877_v12, 0.0 }
 0x3cb   : > { %v4844_v53 = vmul.f32 1.442695, %v4806_v50  ;;  %4900 = vadd.xlane.f32.xlu0 %v4899_v34 }
 0x3cc   : > { %v10884_v8 = vpop.eup %9040  ;;  %v4730_v51 = vpop.xlane.xlu1 %4729  ;;  %v4850_v23 = vmul.f32 1.442695, %v4809_v2 }
 0x3cd   : > { %9048 = vpow2.f32 %v4844_v53  ;;  %v4808_v6 = vsub.f32 %v10767_v39, %v4730_v51  ;;  %v4739_v54 = vpop.xlane.xlu0 %4738  ;;  %v4905_v58 = vsel %vm2271_vm2, %v10884_v8, 0.0 }
 0x3ce   : > { %v10889_v4 = vpop.eup %9042  ;;  %9050 = vpow2.f32 %v4850_v23  ;;  %v4811_v19 = vsub.f32 %v10769_v29, %v4739_v54 }
 0x3cf   : > { %v4908_v14 = vsel %vm2271_vm2, %v10889_v4, 0.0  ;;  %4906 = vadd.xlane.f32.xlu0 %v4905_v58  ;;  %v4848_v41 = vmul.f32 1.442695, %v4808_v6 }
 0x3d0   : > { %v10894_v15 = vpop.eup %9044  ;;  %v4854_v21 = vmul.f32 1.442695, %v4811_v19  ;;  %4909 = vadd.xlane.f32.xlu1 %v4908_v14 }
 0x3d1   : > { %v4736_v49 = vpop.xlane.xlu1 %4735  ;;  %v4917_v56 = vsel %vm2271_vm2, %v10894_v15, 0.0 }
 0x3d2   : > { %v4810_v39 = vsub.f32 %v10775_v32, %v4736_v49  ;;  %9052 = vpow2.f32 %v4854_v21 }
 0x3d3   : > { %v4745_v50 = vpop.xlane.xlu0 %4744  ;;  %4918 = vadd.xlane.f32.xlu0 %v4917_v56  ;;  %9054 = vpow2.f32 %v4848_v41 }
 0x3d4   : > { %v4813_v52 = vsub.f32 %v10777_v33, %v4745_v50  ;;  %v4852_v29 = vmul.f32 1.442695, %v4810_v39  ;;  %v10900_v25 = vpop.eup %9046 }
 0x3d5   : > { %v4911_v51 = vsel %vm2271_vm2, %v10900_v25, 0.0 }
 0x3d6   : > { %v4858_v53 = vmul.f32 1.442695, %v4813_v52  ;;  %9056 = vpow2.f32 %v4852_v29  ;;  %v4742_v2 = vpop.xlane.xlu1 %4741 }
 0x3d7   : > { %v4751_v34 = vpop.xlane.xlu0 %4750  ;;  %v10904_v32 = vpop.eup %9048  ;;  %v4812_v23 = vsub.f32 %v10783_v44, %v4742_v2  ;;  %4912 = vadd.xlane.f32.xlu0 %v4911_v51 }
 0x3d8   : > { %v4815_v6 = vsub.f32 %v10785_v35, %v4751_v34  ;;  %v4914_v33 = vsel %vm2271_vm2, %v10904_v32, 0.0  ;;  %v10910_v54 = vpop.eup %9050  ;;  %9058 = vpow2.f32 %v4858_v53 }
 0x3d9   : > { %v4856_v58 = vmul.f32 1.442695, %v4812_v23  ;;  %4915 = vadd.xlane.f32.xlu1 %v4914_v33  ;;  %v4923_v49 = vsel %vm2271_vm2, %v10910_v54, 0.0 }
 0x3da   : > { %v4862_v19 = vmul.f32 1.442695, %v4815_v6 }
 0x3db   : > { %v4748_v14 = vpop.xlane.xlu1 %4747  ;;  %v4757_v41 = vpop.xlane.xlu0 %4756  ;;  %9060 = vpow2.f32 %v4856_v58  ;;  %4924 = vadd.xlane.f32.xlu0 %v4923_v49 }
 0x3dc   : > { %v4814_v44 = vsub.f32 %v10791_v17, %v4748_v14  ;;  %v4817_v35 = vsub.f32 %v10793_v47, %v4757_v41  ;;  %v10916_v21 = vpop.eup %9052  ;;  %9062 = vpow2.f32 %v4862_v19 }
 0x3dd   : > { %v4929_v29 = vsel %vm2271_vm2, %v10916_v21, 0.0  ;;  %v10920_v53 = vpop.eup %9054 }
 0x3de   : > { %v4860_v39 = vmul.f32 1.442695, %v4814_v44  ;;  %v4866_v50 = vmul.f32 1.442695, %v4817_v35  ;;  %4930 = vadd.xlane.f32.xlu1 %v4929_v29  ;;  %v4920_v33 = vsel %vm2271_vm2, %v10920_v53, 0.0 }
 0x3df   : > { %v4754_v56 = vpop.xlane.xlu1 %4753  ;;  %v4763_v52 = vpop.xlane.xlu0 %4762 }
 0x3e0   : > { %9064 = vpow2.f32 %v4860_v39  ;;  %v4816_v2 = vsub.f32 %v10799_v9, %v4754_v56  ;;  %v4819_v17 = vsub.f32 %v10801_v59, %v4763_v52  ;;  %v10924_v47 = vpop.eup %9056 }
 0x3e1   : > { %9066 = vpow2.f32 %v4866_v50  ;;  %v4926_v51 = vsel %vm2271_vm2, %v10924_v47, 0.0 }
 0x3e2   : > { %v4870_v34 = vmul.f32 1.442695, %v4819_v17  ;;  %v4864_v23 = vmul.f32 1.442695, %v4816_v2  ;;  %4927 = vadd.xlane.f32.xlu0 %v4926_v51  ;;  %v10930_v58 = vpop.eup %9058  ;;  %4921 = vadd.xlane.f32.xlu1 %v4920_v33 }
 0x3e3   : > { %v4760_v6 = vpop.xlane.xlu1 %4759  ;;  %v4769_v19 = vpop.xlane.xlu0 %4768  ;;  %v4935_v44 = vsel %vm2271_vm2, %v10930_v58, 0.0 }
 0x3e4   : > { %9068 = vpow2.f32 %v4870_v34  ;;  %v4821_v59 = vsub.f32 %v10809_v27, %v4769_v19  ;;  %v4818_v14 = vsub.f32 %v10807_v60, %v4760_v6 }
 0x3e5   : > { %v10933_v9 = vpop.eup %9060  ;;  %9070 = vpow2.f32 %v4864_v23 }
 0x3e6   : > { %v4874_v41 = vmul.f32 1.442695, %v4821_v59  ;;  %v4932_v49 = vsel %vm2271_vm2, %v10933_v9, 0.0  ;;  %v10940_v35 = vpop.eup %9062  ;;  %4936 = vadd.xlane.f32.xlu1 %v4935_v44  ;;  %v4868_v27 = vmul.f32 1.442695, %v4818_v14 }
 0x3e7   : > { %4933 = vadd.xlane.f32.xlu0 %v4932_v49  ;;  %v4766_v39 = vpop.xlane.xlu1 %4765  ;;  %v4941_v2 = vsel %vm2271_vm2, %v10940_v35, 0.0 }
 0x3e8   : > { %v4775_v50 = vpop.xlane.xlu0 %4774  ;;  %v4820_v52 = vsub.f32 %v10815_v3, %v4766_v39  ;;  %9072 = vpow2.f32 %v4874_v41 }
 0x3e9   : > { %v4823_v60 = vsub.f32 %v10817_v16, %v4775_v50 }
 0x3ea   : > { %v10942_v56 = vpop.eup %9064  ;;  %v4872_v34 = vmul.f32 1.442695, %v4820_v52  ;;  %4942 = vadd.xlane.f32.xlu1 %v4941_v2 }
 0x3eb   : > { %v4938_v29 = vsel %vm2271_vm2, %v10942_v56, 0.0  ;;  %v10950_v17 = vpop.eup %9066  ;;  %v4878_v16 = vmul.f32 1.442695, %v4823_v60 }
 0x3ec   : > { %4939 = vadd.xlane.f32.xlu0 %v4938_v29  ;;  %v4772_v51 = vpop.xlane.xlu1 %4771  ;;  %9074 = vpow2.f32 %v4872_v34  ;;  %v4947_v19 = vsel %vm2271_vm2, %v10950_v17, 0.0 }
 0x3ed   : > { %v4822_v23 = vsub.f32 %v10823_v43, %v4772_v51  ;;  %v4781_v6 = vpop.xlane.xlu0 %4780  ;;  %9076 = vpow2.f32 %v4868_v27 }
 0x3ee   : > { %v10953_v3 = vpop.eup %9068  ;;  %v4825_v33 = vsub.f32 %v10825_v24, %v4781_v6  ;;  %4948 = vadd.xlane.f32.xlu1 %v4947_v19 }
 0x3ef   : > { %v4876_v59 = vmul.f32 1.442695, %v4822_v23  ;;  %v4953_v14 = vsel %vm2271_vm2, %v10953_v3, 0.0  ;;  %v10960_v41 = vpop.eup %9070 }
 0x3f0   : > { %v4778_v49 = vpop.xlane.xlu1 %4777  ;;  %4954 = vadd.xlane.f32.xlu0 %v4953_v14  ;;  %v4882_v44 = vmul.f32 1.442695, %v4825_v33  ;;  %v4944_v50 = vsel %vm2271_vm2, %v10960_v41, 0.0 }
 0x3f1   : > { %9078 = vpow2.f32 %v4876_v59  ;;  %v4824_v43 = vsub.f32 %v10831_v40, %v4778_v49  ;;  %v4787_v39 = vpop.xlane.xlu0 %4786 }
 0x3f2   : > { %9080 = vpow2.f32 %v4878_v16  ;;  %v4827_v24 = vsub.f32 %v10833_v11, %v4787_v39  ;;  %v10966_v27 = vpop.eup %9072 }
 0x3f3   : > { %v4880_v52 = vmul.f32 1.442695, %v4824_v43  ;;  %9082 = vpow2.f32 %v4882_v44  ;;  %v4959_v11 = vsel %vm2271_vm2, %v10966_v27, 0.0 }
 0x3f4   : > { %v4784_v60 = vpop.xlane.xlu1 %4783  ;;  %v4886_v29 = vmul.f32 1.442695, %v4827_v24  ;;  %4945 = vadd.xlane.f32.xlu0 %v4944_v50 }
 0x3f5   : > { %v4826_v2 = vsub.f32 %v10839_v57, %v4784_v60  ;;  %v4793_v34 = vpop.xlane.xlu0 %4792 }
 0x3f6   : > { %9084 = vpow2.f32 %v4886_v29  ;;  %v4829_v40 = vsub.f32 %v10841_v38, %v4793_v34  ;;  %v10970_v51 = vpop.eup %9074 }
 0x3f7   : > { %v4884_v23 = vmul.f32 1.442695, %v4826_v2  ;;  %v10974_v6 = vpop.eup %9076  ;;  %9086 = vpow2.f32 %v4880_v52  ;;  %v4956_v19 = vsel %vm2271_vm2, %v10970_v51, 0.0 }
 0x3f8   : > { %v4790_v16 = vpop.xlane.xlu1 %4789  ;;  %v4890_v33 = vmul.f32 1.442695, %v4829_v40  ;;  %4960 = vadd.xlane.f32.xlu0 %v4959_v11  ;;  %4957 = vadd.xlane.f32.xlu1 %v4956_v19  ;;  %v4950_v43 = vsel %vm2271_vm2, %v10974_v6, 0.0 }
 0x3f9   : > { %v4828_v57 = vsub.f32 %v10847_v10, %v4790_v16  ;;  %v4799_v59 = vpop.xlane.xlu0 %4798  ;;  %9088 = vpow2.f32 %v4884_v23 }
 0x3fa   : > { %v4831_v38 = vsub.f32 %v10849_v37, %v4799_v59  ;;  %9090 = vpow2.f32 %v4890_v33 }
 0x3fb   : > { %v10980_v14 = vpop.eup %9078  ;;  %v4888_v49 = vmul.f32 1.442695, %v4828_v57 }
 0x3fc   : > { %v10984_v44 = vpop.eup %9080  ;;  %v4796_v39 = vpop.xlane.xlu1 %4795  ;;  %v4894_v24 = vmul.f32 1.442695, %v4831_v38  ;;  %v4962_v50 = vsel %vm2271_vm2, %v10980_v14, 0.0  ;;  %4951 = vadd.xlane.f32.xlu0 %v4950_v43 }
 0x3fd   : > { %v4830_v10 = vsub.f32 %v10855_v62, %v4796_v39  ;;  %4963 = vadd.xlane.f32.xlu1 %v4962_v50  ;;  %9092 = vpow2.f32 %v4888_v49  ;;  %v10989_v37 = vpop.eup %9082  ;;  %v4965_v60 = vsel %vm2271_vm2, %v10984_v44, 0.0  ;;  %v1744_v50 = vcombine.high %v10436_v61, %v10470_v18 }
 0x3fe   : > { %9094 = vpow2.f32 %v4894_v24  ;;  %v4971_v62 = vsel %vm2271_vm2, %v10989_v37, 0.0  ;;  %v1760_v24 = vcombine.high %v10507_v7, %v10544_v5 }
 0x3ff   : > { %v4892_v52 = vmul.f32 1.442695, %v4830_v10  ;;  %v1776_v10 = vcombine.high %v10457_v22, %v10500_v63 }
 0x400   : > { %v10993_v29 = vpop.eup %9084  ;;  %4966 = vadd.xlane.f32.xlu0 %v4965_v60  ;;  %v1728_v60 = vcombine.high %v9587_v30, %v10423_v0 }
 0x401   : > { %v4977_v2 = vsel %vm2271_vm2, %v10993_v29, 0.0  ;;  %v10997_v34 = vpop.eup %9086  ;;  %9096 = vpow2.f32 %v4892_v52  ;;  %v1790_v7 = vrot.slane %v1776_v10, %v9829_v13  ;;  %v1895_v10 = vcombine.low %v10570_v42, %v10612_v20 }
 0x402   : > { %4978 = vadd.xlane.f32.xlu1 %v4977_v2  ;;  %v4968_v23 = vsel %vm2271_vm2, %v10997_v34, 0.0  ;;  %v1774_v2 = vrot.slane %v1760_v24, %v9829_v13  ;;  %v1742_v5 = vrot.slane %v1728_v60, %v9829_v13  ;;  %v11633_v60 = vld [vmem:[#allocation13_spill] sm:$0xff] }
 0x403   : > { %v11001_v40 = vpop.eup %9088 }
 0x404   : > { %4972 = vadd.xlane.f32.xlu0 %v4971_v62  ;;  %v11005_v11 = vpop.eup %9090  ;;  %v4974_v16 = vsel %vm2271_vm2, %v11001_v40, 0.0 }
 0x405   : > { %v4983_v19 = vsel %vm2271_vm2, %v11005_v11, 0.0 }
 0x406   : > { %4969 = vadd.xlane.f32.xlu1 %v4968_v23  ;;  %v1839_v23 = vcombine.low %v1774_v2, %v1790_v7 }
 0x407   : > { %v11009_v33 = vpop.eup %9092 }
 0x408   : > { %4975 = vadd.xlane.f32.xlu0 %v4974_v16  ;;  %v11013_v57 = vpop.eup %9094  ;;  %v4980_v59 = vsel %vm2271_vm2, %v11009_v33, 0.0  ;;  %v1847_v16 = vrot.slane %v1839_v23, %v9851_v28 }
 0x409   : > { %v4989_v49 = vsel %vm2271_vm2, %v11013_v57, 0.0 }
 0x40a   : > { %4984 = vadd.xlane.f32.xlu1 %v4983_v19 }
 0x40b   : > { %v11017_v38 = vpop.eup %9096 }
 0x40c   : > { %4981 = vadd.xlane.f32.xlu0 %v4980_v59  ;;  %v4986_v43 = vsel %vm2271_vm2, %v11017_v38, 0.0  ;;  %v1840_v59 = vcombine.high %v1774_v2, %v1790_v7 }
 0x40e   : > { %4990 = vadd.xlane.f32.xlu1 %v4989_v49  ;;  %v1911_v49 = vcombine.low %v10628_v48, %v10645_v1 }
 0x410   : > { %4987 = vadd.xlane.f32.xlu0 %v4986_v43  ;;  %v11631_v43 = vcombine.low %v10619_v55, %v10597_v31 }
 0x41f   : > { %1721 = vrot.lane.b32.xlu1 %v9611_v36, %s9334_s9 }
 0x426   : > { %1709 = vrot.lane.b32.xlu0 %v9611_v36, %s9332_s30  ;;  %v1758_v36 = vrot.slane %v1744_v50, %v9829_v13  ;;  %s8428_s30 = sshll.u32 %s9394_s19, 9  ;;  %s9248_s19 = scalar_lea.vmem %s11493_s8, 512 }
 0x427   : > { %s11498_s13 = scalar_lea.hbm %s11549_s4, %s8428_s30  ;;  %p9249_p11 = scmp.ne.s32.totalorder %s11493_s8, %s9248_s19 }
 0x428   : > { %v1807_v63 = vcombine.low %v1742_v5, %v1758_v36  ;;  %v1808_v24 = vcombine.high %v1742_v5, %v1758_v36  ;;  %v11635_v36 = vld [vmem:[#allocation12_spill] sm:$0xff] }
 0x429   : > { %p9250_p1 = pnand %p9249_p11, %p11663_p0 }
 0x42b   : > { %p9251_p3 = pneg %p9250_p1 }
 0x453   : > { %v4898_v39 = vpop.xlane.xlu1 %4897 }
 0x454   : > { %9098 = vrcp.f32 %v4898_v39  ;;  %v1815_v39 = vrot.slane %v1807_v63, %v9851_v28 }
 0x456   : > { %v1859_v23 = vcombine.low %v1815_v39, %v1847_v16 }
 0x457   : > { %v4904_v52 = vpop.xlane.xlu1 %4903 }
 0x458   : > { %9100 = vrcp.f32 %v4904_v52  ;;  %v4901_v62 = vpop.xlane.xlu0 %4900  ;;  %v11632_v52 = vld [vmem:[#allocation15_spill] sm:$0xff] }
 0x459   : > { %9102 = vrcp.f32 %v4901_v62  ;;  %v1879_v2 = vcombine.low %v11633_v60, %v11632_v52 }
 0x45c   : > { %v4907_v61 = vpop.xlane.xlu0 %4906 }
 0x45d   : > { %v4910_v18 = vpop.xlane.xlu1 %4909  ;;  %9104 = vrcp.f32 %v4907_v61 }
 0x45e   : > { %v9099_v22 = vpop.eup %9098  ;;  %9106 = vrcp.f32 %v4910_v18  ;;  %v11634_v18 = vld [vmem:[#allocation14_spill] sm:$0xff] }
 0x45f   : > { %v4993_v30 = vmul.f32 %v9099_v22, %v10869_v26  ;;  %v1863_v5 = vcombine.low %v11635_v36, %v11634_v18  ;;  %v1854_v22 = vrot.slane %v1840_v59, %v9851_v28 }
 0x460   : > { %v4919_v0 = vpop.xlane.xlu0 %4918 }
 0x461   : > { %8732 = vmatmul.mubr.msk.f32.vlgmr.msra.gmra.mrb[34].mxu1 %vm2271_vm2, %v4993_v30  ;;  %v1822_v30 = vrot.slane %v1808_v24, %v9851_v28 }
 0x462   : > { %v9101_v19 = vpop.eup %9100  ;;  %8740 = vmatpush3.msra.mxu1 %v11631_v43  ;;  %8741 = vmatprep.mubr.msk.f32.mxu1 %vm9336_vm1, %v11598_v45  ;;  %v11073_v43 = vrot.slane %v1879_v2, %v9829_v13 }
 0x463   : > { %v9103_v26 = vpop.eup %9102  ;;  %v4997_v50 = vmul.f32 %v9101_v19, %v10874_v46  ;;  %8749 = vmatprep.subr.mxu1 %v11598_v45  ;;  %v11061_v46 = vrot.slane %v1911_v49, %v9829_v13  ;;  %v1903_v49 = vrot.slane %v1895_v10, %v9829_v13 }
 0x464   : > { %v4995_v62 = vmul.f32 %v9103_v26, %v10877_v12  ;;  %v4913_v7 = vpop.xlane.xlu0 %4912  ;;  %v11636_v12 = vcombine.high %v10619_v55, %v10597_v31  ;;  %v1860_v55 = vcombine.high %v1815_v39, %v1847_v16 }
 0x465   : > { %9108 = vrcp.f32 %v4913_v7  ;;  %8742 = vmatmul.mubr.msk.f32.vlgmr.msra.gmra.mrb[36].mxu1 %vm2271_vm2, %v4997_v50  ;;  %v1959_v24 = vcombine.low %v1903_v49, %v11061_v46  ;;  %v1861_v50 = vcombine.low %v1822_v30, %v1854_v22  ;;  %v1880_v7 = vcombine.high %v11633_v60, %v11632_v52 }
 0x466   : > { %v4916_v61 = vpop.xlane.xlu1 %4915  ;;  %8737 = vmatmul.mubr.msk.f32.vlgmr.msra.gmra.mrb[38].mxu0 %vm2271_vm2, %v4995_v62  ;;  %8750 = vmatpush3.msra.mxu1 %v1859_v23  ;;  %v1896_v62 = vcombine.high %v10570_v42, %v10612_v20  ;;  %v1862_v20 = vcombine.high %v1822_v30, %v1854_v22 }
 0x467   : > { %9110 = vrcp.f32 %v4916_v61  ;;  %v9105_v63 = vpop.eup %9104  ;;  %8745 = vmatpush3.msra.mxu0 %v11636_v12  ;;  %8746 = vmatprep.mubr.msk.f32.mxu0 %vm9336_vm1, %v11598_v45  ;;  %v1967_v39 = vrot.slane %v1959_v24, %v9851_v28 }
 0x468   : > { %9112 = vrcp.f32 %v4919_v0  ;;  %v9107_v19 = vpop.eup %9106  ;;  %v4999_v26 = vmul.f32 %v9105_v63, %v10884_v8  ;;  %v4925_v59 = vpop.xlane.xlu0 %4924  ;;  %8751 = vmatprep.mubr.msk.f32.mxu1 %vm9336_vm1, %v11598_v45  ;;  %8754 = vmatprep.subr.mxu0 %v11598_v45  ;;  %v1871_v0 = vrot.slane %v1863_v5, %v9829_v13  ;;  %v1910_v60 = vrot.slane %v1896_v62, %v9829_v13 }
 0x469   : > { %v5001_v31 = vmul.f32 %v9107_v19, %v10889_v4  ;;  %8759 = vmatprep.subr.mxu1 %v11598_v45  ;;  %9114 = vrcp.f32 %v4925_v59  ;;  %v1912_v4 = vcombine.high %v10628_v48, %v10645_v1  ;;  %v1864_v1 = vcombine.high %v11635_v36, %v11634_v18 }
 0x46a   : > { %8747 = vmatmul.mubr.msk.f32.vlgmr.msra.gmra.mrb[40].mxu0 %vm2271_vm2, %v4999_v26  ;;  %v1927_v10 = vcombine.low %v1871_v0, %v11073_v43  ;;  %v1960_v19 = vcombine.high %v1903_v49, %v11061_v46  ;;  %v1894_v18 = vrot.slane %v1880_v7, %v9829_v13 }
 0x46b   : > { %8752 = vmatmul.mubr.msk.f32.vlgmr.msra.gmra.mrb[38].mxu1 %vm2271_vm2, %v5001_v31  ;;  %8755 = vmatpush3.msra.mxu0 %v1860_v55  ;;  %v4931_v8 = vpop.xlane.xlu1 %4930  ;;  %v1926_v12 = vrot.slane %v1912_v4, %v9829_v13  ;;  %v1878_v46 = vrot.slane %v1864_v1, %v9829_v13 }
 0x46c   : > { %8760 = vmatpush3.msra.mxu1 %v1861_v50  ;;  %8756 = vmatprep.mubr.msk.f32.mxu0 %vm9336_vm1, %v11598_v45  ;;  %9116 = vrcp.f32 %v4931_v8  ;;  %v1935_v5 = vrot.slane %v1927_v10, %v9851_v28 }
 0x46d   : > { %8761 = vmatprep.mubr.msk.f32.mxu1 %vm9336_vm1, %v11598_v45  ;;  %8764 = vmatprep.subr.mxu0 %v11598_v45  ;;  %v1975_v30 = vcombine.low %v1910_v60, %v1926_v12  ;;  %v1976_v50 = vcombine.high %v1910_v60, %v1926_v12 }
 0x46e   : > { %8769 = vmatprep.subr.mxu1 %v11598_v45  ;;  %v1991_v52 = vcombine.low %v1935_v5, %v1967_v39  ;;  %v1992_v49 = vcombine.high %v1935_v5, %v1967_v39 }
 0x46f   : > { %v4928_v16 = vpop.xlane.xlu0 %4927  ;;  %v9109_v2 = vpop.eup %9108  ;;  %v1983_v10 = vrot.slane %v1975_v30, %v9851_v28 }
 0x470   : > { %v4922_v23 = vpop.xlane.xlu1 %4921  ;;  %v5003_v61 = vmul.f32 %v9109_v2, %v10900_v25  ;;  %v1928_v25 = vcombine.high %v1871_v0, %v11073_v43  ;;  %v1974_v43 = vrot.slane %v1960_v19, %v9851_v28 }
 0x471   : > { %v9111_v48 = vpop.eup %9110  ;;  %9118 = vrcp.f32 %v4922_v23 }
 0x472   : > { %v9113_v63 = vpop.eup %9112  ;;  %v5005_v42 = vmul.f32 %v9111_v48, %v10904_v32  ;;  %9120 = vrcp.f32 %v4928_v16  ;;  %8757 = vmatmul.mubr.msk.f32.vlgmr.msra.gmra.mrb[42].mxu0 %vm2271_vm2, %v5003_v61  ;;  %v1942_v55 = vrot.slane %v1928_v25, %v9851_v28  ;;  %v1944_v16 = vcombine.high %v1878_v46, %v1894_v18 }
 0x473   : > { %8765 = vmatpush3.msra.mxu0 %v1862_v20  ;;  %v5007_v32 = vmul.f32 %v9113_v63, %v10894_v15  ;;  %8766 = vmatprep.mubr.msk.f32.mxu0 %vm9336_vm1, %v11598_v45  ;;  %v9115_v22 = vpop.eup %9114  ;;  %v1943_v15 = vcombine.low %v1878_v46, %v1894_v18  ;;  %v11637_v46 = vld [vmem:[#allocation16_spill] sm:$0xff] }
 0x474   : > { %v4934_v36 = vpop.xlane.xlu0 %4933  ;;  %8762 = vmatmul.mubr.msk.f32.vlgmr.msra.gmra.mrb[40].mxu1 %vm2271_vm2, %v5005_v42  ;;  %v4937_v26 = vpop.xlane.xlu1 %4936  ;;  %8774 = vmatprep.subr.mxu0 %v11598_v45  ;;  %v5011_v0 = vmul.f32 %v9115_v22, %v10910_v54  ;;  %v1994_v8 = vcombine.high %v1942_v55, %v1974_v43  ;;  %v1993_v48 = vcombine.low %v1942_v55, %v1974_v43 }
 0x475   : > { %8770 = vmatpush3.msra.mxu1 %v1991_v52  ;;  %9122 = vrcp.f32 %v4937_v26  ;;  %8771 = vmatprep.mubr.msk.f32.mxu1 %vm9336_vm1, %v11598_v45  ;;  %v1951_v54 = vrot.slane %v1943_v15, %v9851_v28  ;;  %v11641_v15 = vld [vmem:[#allocation17_spill] sm:$0xff] }
 0x476   : > { %9124 = vrcp.f32 %v4934_v36  ;;  %8767 = vmatmul.mubr.msk.f32.vlgmr.msra.gmra.mrb[44].mxu0 %vm2271_vm2, %v5007_v32  ;;  %8779 = vmatprep.subr.mxu1 %v11598_v45  ;;  %v9117_v24 = vpop.eup %9116  ;;  %v11638_v32 = vld [vmem:[#allocation18_spill] sm:$0xff] }
 0x477   : > { %8775 = vmatpush3.msra.mxu0 %v1992_v49  ;;  %8776 = vmatprep.mubr.msk.f32.mxu0 %vm9336_vm1, %v11598_v45  ;;  %v5015_v7 = vmul.f32 %v9117_v24, %v10916_v21  ;;  %v1996_v1 = vcombine.high %v1951_v54, %v1983_v10  ;;  %v1958_v21 = vrot.slane %v1944_v16, %v9851_v28 }
 0x478   : > { %v4943_v31 = vpop.xlane.xlu1 %4942  ;;  %8784 = vmatprep.subr.mxu0 %v11598_v45  ;;  %v1995_v42 = vcombine.low %v1951_v54, %v1983_v10  ;;  %v11639_v22 = vcombine.high %v11637_v46, %v11638_v32  ;;  %v11646_v10 = vld [vmem:[#allocation20_spill] sm:$0xff] }
 0x479   : > { %v4940_v59 = vpop.xlane.xlu0 %4939  ;;  %9126 = vrcp.f32 %v4943_v31 }
 0x47a   : > { %9128 = vrcp.f32 %v4940_v59  ;;  %8777 = vmatmul.mubr.msk.f32.vlgmr.msra.gmra.mrb[46].mxu0 %vm2271_vm2, %v5011_v0  ;;  %v11642_v59 = vld [vmem:[#allocation19_spill] sm:$0xff] }
 0x47b   : > { %v9119_v4 = vpop.eup %9118  ;;  %8785 = vmatpush3.msra.mxu0 %v1994_v8  ;;  %8786 = vmatprep.mubr.msk.f32.mxu0 %vm9336_vm1, %v11598_v45  ;;  %v11643_v31 = vcombine.high %v11641_v15, %v11642_v59 }
 0x47c   : > { %v5009_v39 = vmul.f32 %v9119_v4, %v10920_v53  ;;  %v4949_v2 = vpop.xlane.xlu1 %4948  ;;  %v9121_v62 = vpop.eup %9120  ;;  %8794 = vmatprep.subr.mxu0 %v11598_v45  ;;  %v1990_v53 = vrot.slane %v1976_v50, %v9851_v28 }
 0x47d   : > { %9130 = vrcp.f32 %v4949_v2  ;;  %v4955_v23 = vpop.xlane.xlu0 %4954  ;;  %v5013_v5 = vmul.f32 %v9121_v62, %v10924_v47  ;;  %v11648_v62 = vld [vmem:[#allocation25_spill] sm:$0xff] }
 0x47e   : > { %8772 = vmatmul.mubr.msk.f32.vlgmr.msra.gmra.mrb[42].mxu1 %vm2271_vm2, %v5009_v39  ;;  %8787 = vmatmul.mubr.msk.f32.vlgmr.msra.gmra.mrb[48].mxu0 %vm2271_vm2, %v5015_v7  ;;  %9132 = vrcp.f32 %v4955_v23  ;;  %v1998_v47 = vcombine.high %v1958_v21, %v1990_v53  ;;  %v1997_v25 = vcombine.low %v1958_v21, %v1990_v53  ;;  %v11649_v7 = vld [vmem:[#allocation21_spill] sm:$0xff] }
 0x47f   : > { %8780 = vmatpush3.msra.mxu1 %v1993_v48  ;;  %v9123_v61 = vpop.eup %9122  ;;  %8795 = vmatpush3.msra.mxu0 %v1996_v1  ;;  %v11650_v23 = vcombine.high %v11648_v62, %v11649_v7 }
 0x480   : > { %8781 = vmatprep.mubr.msk.f32.mxu1 %vm9336_vm1, %v11598_v45  ;;  %v9125_v63 = vpop.eup %9124  ;;  %v5019_v12 = vmul.f32 %v9123_v61, %v10930_v58  ;;  %8789 = vmatprep.subr.mxu1 %v11598_v45 }
 0x481   : > { %v4946_v19 = vpop.xlane.xlu0 %4945  ;;  %8796 = vmatprep.mubr.msk.f32.mxu0 %vm9336_vm1, %v11598_v45  ;;  %8804 = vmatprep.subr.mxu0 %v11598_v45  ;;  %v5017_v52 = vmul.f32 %v9125_v63, %v10933_v9 }
 0x482   : > { %9134 = vrcp.f32 %v4946_v19  ;;  %8782 = vmatmul.mubr.msk.f32.vlgmr.msra.gmra.mrb[44].mxu1 %vm2271_vm2, %v5013_v5  ;;  %8797 = vmatmul.mubr.msk.f32.vlgmr.msra.gmra.mrb[50].mxu0 %vm2271_vm2, %v5019_v12 }
 0x483   : > { %8790 = vmatpush3.msra.mxu1 %v1995_v42  ;;  %v9127_v20 = vpop.eup %9126  ;;  %8805 = vmatpush3.msra.mxu0 %v1998_v47  ;;  %v11652_v42 = vcombine.low %v11648_v62, %v11649_v7 }
 0x484   : > { %8791 = vmatprep.mubr.msk.f32.mxu1 %vm9336_vm1, %v11598_v45  ;;  %v9129_v58 = vpop.eup %9128  ;;  %v5023_v60 = vmul.f32 %v9127_v20, %v10940_v35  ;;  %8799 = vmatprep.subr.mxu1 %v11598_v45  ;;  %v11653_v20 = vld [vmem:[#allocation29_spill] sm:$0xff] }
 0x485   : > { %v4961_v18 = vpop.xlane.xlu0 %4960  ;;  %8806 = vmatprep.mubr.msk.f32.mxu0 %vm9336_vm1, %v11598_v45  ;;  %v4958_v36 = vpop.xlane.xlu1 %4957  ;;  %8814 = vmatprep.subr.mxu0 %v11598_v45  ;;  %v5021_v26 = vmul.f32 %v9129_v58, %v10942_v56 }
 0x486   : > { %9136 = vrcp.f32 %v4961_v18  ;;  %8792 = vmatmul.mubr.msk.f32.vlgmr.msra.gmra.mrb[46].mxu1 %vm2271_vm2, %v5017_v52  ;;  %8807 = vmatmul.mubr.msk.f32.vlgmr.msra.gmra.mrb[52].mxu0 %vm2271_vm2, %v5023_v60  ;;  %v11654_v60 = vld [vmem:[#allocation28_spill] sm:$0xff] }
 0x487   : > { %v9131_v9 = vpop.eup %9130  ;;  %8800 = vmatpush3.msra.mxu1 %v1997_v25  ;;  %8815 = vmatpush3.msra.mxu0 %v11639_v22 }
 0x488   : > { %v5027_v35 = vmul.f32 %v9131_v9, %v10950_v17  ;;  %8801 = vmatprep.mubr.msk.f32.mxu1 %vm9336_vm1, %v11598_v45  ;;  %8809 = vmatprep.subr.mxu1 %v11598_v45  ;;  %v9133_v49 = vpop.eup %9132  ;;  %v11640_v17 = vcombine.low %v11637_v46, %v11638_v32 }
 0x489   : > { %v4952_v30 = vpop.xlane.xlu0 %4951  ;;  %8816 = vmatprep.mubr.msk.f32.mxu0 %vm9336_vm1, %v11598_v45  ;;  %8824 = vmatprep.subr.mxu0 %v11598_v45  ;;  %v5031_v55 = vmul.f32 %v9133_v49, %v10953_v3  ;;  %v11644_v3 = vcombine.low %v11641_v15, %v11642_v59  ;;  %v11655_v49 = vld [vmem:[#allocation22_spill] sm:$0xff] }
 0x48a   : > { %9138 = vrcp.f32 %v4952_v30  ;;  %8802 = vmatmul.mubr.msk.f32.vlgmr.msra.gmra.mrb[48].mxu1 %vm2271_vm2, %v5021_v26  ;;  %v4964_v56 = vpop.xlane.xlu1 %4963  ;;  %8817 = vmatmul.mubr.msk.f32.vlgmr.msra.gmra.mrb[54].mxu0 %vm2271_vm2, %v5027_v35 }
 0x48b   : > { %8810 = vmatpush3.msra.mxu1 %v11640_v17  ;;  %9140 = vrcp.f32 %v4958_v36  ;;  %8825 = vmatpush3.msra.mxu0 %v11643_v31 }
 0x48c   : > { %v9135_v43 = vpop.eup %9134  ;;  %8811 = vmatprep.mubr.msk.f32.mxu1 %vm9336_vm1, %v11598_v45  ;;  %8819 = vmatprep.subr.mxu1 %v11598_v45 }
 0x48d   : > { %v5025_v0 = vmul.f32 %v9135_v43, %v10960_v41  ;;  %v4967_v24 = vpop.xlane.xlu0 %4966  ;;  %8826 = vmatprep.mubr.msk.f32.mxu0 %vm9336_vm1, %v11598_v45  ;;  %8834 = vmatprep.subr.mxu0 %v11598_v45  ;;  %v11645_v41 = vld [vmem:[#allocation24_spill] sm:$0xff] }
 0x48e   : > { %9142 = vrcp.f32 %v4967_v24  ;;  %8827 = vmatmul.mubr.msk.f32.vlgmr.msra.gmra.mrb[56].mxu0 %vm2271_vm2, %v5031_v55  ;;  %v11647_v4 = vcombine.high %v11645_v41, %v11646_v10  ;;  %v11651_v5 = vcombine.low %v11645_v41, %v11646_v10 }
 0x48f   : > { %v4979_v50 = vpop.xlane.xlu1 %4978  ;;  %8812 = vmatmul.mubr.msk.f32.vlgmr.msra.gmra.mrb[50].mxu1 %vm2271_vm2, %v5025_v0  ;;  %9144 = vrcp.f32 %v4964_v56  ;;  %8836 = vmatprep.mubr.msk.f32.mxu0 %vm9336_vm1, %v11598_v45  ;;  %v11656_v56 = vld [vmem:[#allocation26_spill] sm:$0xff] }
 0x490   : > { %v9137_v8 = vpop.eup %9136  ;;  %8820 = vmatpush3.msra.mxu1 %v11644_v3  ;;  %8835 = vmatpush3.msra.mxu0 %v11647_v4  ;;  %v11657_v17 = vcombine.low %v11655_v49, %v11656_v56  ;;  %v11658_v24 = vcombine.high %v11655_v49, %v11656_v56 }
 0x491   : > { %v5035_v16 = vmul.f32 %v9137_v8, %v10966_v27  ;;  %v4973_v39 = vpop.xlane.xlu0 %4972  ;;  %8844 = vmatprep.subr.mxu0 %v11598_v45  ;;  %8821 = vmatprep.mubr.msk.f32.mxu1 %vm9336_vm1, %v11598_v45 }
 0x492   : > { %8829 = vmatprep.subr.mxu1 %v11598_v45  ;;  %9146 = vrcp.f32 %v4973_v39  ;;  %v2207_v43 = vrot.slane %v11657_v17, %v9851_v28 }
 0x493   : > { %v4970_v2 = vpop.xlane.xlu1 %4969  ;;  %8837 = vmatmul.mubr.msk.f32.vlgmr.msra.gmra.mrb[58].mxu0 %vm2271_vm2, %v5035_v16 }
 0x494   : > { %v9139_v54 = vpop.eup %9138  ;;  %8845 = vmatpush3.msra.mxu0 %v11650_v23  ;;  %8846 = vmatprep.mubr.msk.f32.mxu0 %vm9336_vm1, %v11598_v45  ;;  %9148 = vrcp.f32 %v4970_v2 }
 0x495   : > { %v5029_v27 = vmul.f32 %v9139_v54, %v10974_v6  ;;  %v4976_v48 = vpop.xlane.xlu0 %4975  ;;  %8854 = vmatprep.subr.mxu0 %v11598_v45  ;;  %v9141_v1 = vpop.eup %9140  ;;  %9150 = vrcp.f32 %v4979_v50  ;;  %v2214_v50 = vrot.slane %v11658_v24, %v9851_v28 }
 0x496   : > { %v5033_v21 = vmul.f32 %v9141_v1, %v10970_v51  ;;  %9152 = vrcp.f32 %v4976_v48 }
 0x497   : > { %v4985_v53 = vpop.xlane.xlu1 %4984  ;;  %8822 = vmatmul.mubr.msk.f32.vlgmr.msra.gmra.mrb[52].mxu1 %vm2271_vm2, %v5029_v27 }
 0x498   : > { %v9143_v61 = vpop.eup %9142  ;;  %8830 = vmatpush3.msra.mxu1 %v11651_v5  ;;  %8831 = vmatprep.mubr.msk.f32.mxu1 %vm9336_vm1, %v11598_v45  ;;  %9154 = vrcp.f32 %v4985_v53 }
 0x499   : > { %v5039_v63 = vmul.f32 %v9143_v61, %v10984_v44  ;;  %v4982_v6 = vpop.xlane.xlu0 %4981  ;;  %8839 = vmatprep.subr.mxu1 %v11598_v45  ;;  %v9145_v12 = vpop.eup %9144 }
 0x49a   : > { %v5037_v51 = vmul.f32 %v9145_v12, %v10980_v14  ;;  %9156 = vrcp.f32 %v4982_v6 }
 0x49b   : > { %v4991_v19 = vpop.xlane.xlu1 %4990  ;;  %8832 = vmatmul.mubr.msk.f32.vlgmr.msra.gmra.mrb[54].mxu1 %vm2271_vm2, %v5033_v21  ;;  %8847 = vmatmul.mubr.msk.f32.vlgmr.msra.gmra.mrb[60].mxu0 %vm2271_vm2, %v5039_v63 }
 0x49c   : > { %8840 = vmatpush3.msra.mxu1 %v11652_v42  ;;  %8841 = vmatprep.mubr.msk.f32.mxu1 %vm9336_vm1, %v11598_v45  ;;  %v9147_v32 = vpop.eup %9146  ;;  %9158 = vrcp.f32 %v4991_v19 }
 0x49d   : > { %v4988_v44 = vpop.xlane.xlu0 %4987  ;;  %8849 = vmatprep.subr.mxu1 %v11598_v45  ;;  %8856 = vmatprep.mubr.msk.f32.mxu0 %vm9336_vm1, %v11598_v45  ;;  %v5043_v3 = vmul.f32 %v9147_v32, %v10989_v37  ;;  %v11659_v37 = vld [vmem:[#allocation23_spill] sm:$0xff] }
 0x49e   : > { %v9149_v30 = vpop.eup %9148  ;;  %9160 = vrcp.f32 %v4988_v44 }
 0x49f   : > { %v1722_v47 = vpop.permute.xlu1 %1721  ;;  %8842 = vmatmul.mubr.msk.f32.vlgmr.msra.gmra.mrb[56].mxu1 %vm2271_vm2, %v5037_v51  ;;  %v5041_v8 = vmul.f32 %v9149_v30, %v10997_v34  ;;  %v9151_v41 = vpop.eup %9150  ;;  %v11660_v34 = vld [vmem:[#allocation27_spill] sm:$0xff] }
 0x4a0   : > { %v2183_v52 = vcombine.low %v11653_v20, %v1722_v47  ;;  %8851 = vmatprep.mubr.msk.f32.mxu1 %vm9336_vm1, %v11598_v45  ;;  %v2184_v25 = vcombine.high %v11653_v20, %v1722_v47  ;;  %v9153_v4 = vpop.eup %9152  ;;  %v11661_v54 = vcombine.low %v11659_v37, %v11660_v34  ;;  %v5047_v23 = vmul.f32 %v9151_v41, %v10993_v29 }
 0x4a1   : > { %v1710_v58 = vpop.permute.xlu0 %1709  ;;  %v5045_v27 = vmul.f32 %v9153_v4, %v11001_v40  ;;  %v11662_v29 = vcombine.high %v11659_v37, %v11660_v34 }
 0x4a2   : > { %v2167_v14 = vcombine.low %v11654_v60, %v1710_v58  ;;  %v2168_v18 = vcombine.high %v11654_v60, %v1710_v58  ;;  %v2191_v36 = vrot.slane %v2183_v52, %v9829_v13  ;;  %v2198_v22 = vrot.slane %v2184_v25, %v9829_v13  ;;  %v9155_v7 = vpop.eup %9154 }
 0x4a3   : > { %v2223_v62 = vrot.slane %v11661_v54, %v9851_v28  ;;  %v2230_v40 = vrot.slane %v11662_v29, %v9851_v28  ;;  %v5051_v21 = vmul.f32 %v9155_v7, %v11005_v11 }
 0x4a4   : > { %v2175_v9 = vrot.slane %v2167_v14, %v9829_v13  ;;  %v2182_v26 = vrot.slane %v2168_v18, %v9829_v13  ;;  %v9157_v48 = vpop.eup %9156 }
 0x4a5   : > { %v5049_v63 = vmul.f32 %v9157_v48, %v11009_v33 }
 0x4a6   : > { %v2231_v35 = vcombine.low %v2175_v9, %v2191_v36  ;;  %v2232_v46 = vcombine.high %v2175_v9, %v2191_v36  ;;  %v2247_v31 = vcombine.low %v2182_v26, %v2198_v22  ;;  %v2248_v10 = vcombine.high %v2182_v26, %v2198_v22  ;;  %v9159_v5 = vpop.eup %9158 }
 0x4a7   : > { %v5055_v11 = vmul.f32 %v9159_v5, %v11013_v57 }
 0x4a8   : > { %v2239_v15 = vrot.slane %v2231_v35, %v9851_v28  ;;  %v2246_v59 = vrot.slane %v2232_v46, %v9851_v28  ;;  %v2255_v16 = vrot.slane %v2247_v31, %v9851_v28  ;;  %v2262_v1 = vrot.slane %v2248_v10, %v9851_v28  ;;  %v9161_v6 = vpop.eup %9160 }
 0x4a9   : > { %v5053_v33 = vmul.f32 %v9161_v6, %v11017_v38 }
 0x4aa   : > { %v2263_v55 = vcombine.low %v2207_v43, %v2239_v15  ;;  %v2264_v0 = vcombine.high %v2207_v43, %v2239_v15  ;;  %v2265_v39 = vcombine.low %v2214_v50, %v2246_v59  ;;  %v2266_v2 = vcombine.high %v2214_v50, %v2246_v59 }
 0x4ab   : > { %v2267_v53 = vcombine.low %v2223_v62, %v2255_v16  ;;  %v2268_v61 = vcombine.high %v2223_v62, %v2255_v16  ;;  %v2269_v12 = vcombine.low %v2230_v40, %v2262_v1  ;;  %v2270_v19 = vcombine.high %v2230_v40, %v2262_v1 }
 0x4ac   : > { %8850 = vmatpush3.msra.mxu1 %v2263_v55  ;;  %8855 = vmatpush3.msra.mxu0 %v2264_v0 }
 0x4ad   : > { %8852 = vmatmul.mubr.msk.f32.vlgmr.msra.gmra.mrb[58].mxu1 %vm2271_vm2, %v5041_v8  ;;  %8857 = vmatmul.mubr.msk.f32.vlgmr.msra.gmra.mrb[62].mxu0 %vm2271_vm2, %v5043_v3 }
 0x4ae   : > { %8859 = vmatprep.subr.mxu1 %v11598_v45  ;;  %8864 = vmatprep.subr.mxu0 %v11598_v45 }
 0x4af   : > { %8860 = vmatpush3.msra.mxu1 %v2265_v39  ;;  %8865 = vmatpush3.msra.mxu0 %v2266_v2 }
 0x4b0   : > { %8861 = vmatprep.mubr.msk.f32.mxu1 %vm9336_vm1, %v11598_v45  ;;  %8866 = vmatprep.mubr.msk.f32.mxu0 %vm9336_vm1, %v11598_v45 }
 0x4b1   : > { %8869 = vmatprep.subr.mxu1 %v11598_v45  ;;  %8874 = vmatprep.subr.mxu0 %v11598_v45 }
 0x4b2   : > { %8862 = vmatmul.mubr.msk.f32.vlgmr.msra.gmra.mrb[60].mxu1 %vm2271_vm2, %v5045_v27  ;;  %8867 = vmatmul.mubr.msk.f32.vlgmr.msra.gmra.mrb[64].mxu0 %vm2271_vm2, %v5047_v23 }
 0x4b3   : > { %8870 = vmatpush3.msra.mxu1 %v2267_v53  ;;  %8875 = vmatpush3.msra.mxu0 %v2268_v61 }
 0x4b4   : > { %8871 = vmatprep.mubr.msk.f32.mxu1 %vm9336_vm1, %v11598_v45  ;;  %8876 = vmatprep.mubr.msk.f32.mxu0 %vm9336_vm1, %v11598_v45 }
 0x4b5   : > { %8879 = vmatprep.subr.mxu1 %v11598_v45  ;;  %8884 = vmatprep.subr.mxu0 %v11598_v45 }
 0x4b6   : > { %8872 = vmatmul.mubr.msk.f32.vlgmr.msra.gmra.mrb[62].mxu1 %vm2271_vm2, %v5049_v63  ;;  %8877 = vmatmul.mubr.msk.f32.vlgmr.msra.gmra.mrb[66].mxu0 %vm2271_vm2, %v5051_v21 }
 0x4b7   : > { %8880 = vmatpush3.msra.mxu1 %v2269_v12  ;;  %8885 = vmatpush3.msra.mxu0 %v2270_v19 }
 0x4b8   : > { %8881 = vmatprep.mubr.msk.f32.mxu1 %vm9336_vm1, %v11598_v45  ;;  %8886 = vmatprep.mubr.msk.f32.mxu0 %vm9336_vm1, %v11598_v45 }
 0x4ba   : > { %8882 = vmatmul.mubr.msk.f32.vlgmr.msra.gmra.mrb[64].mxu1 %vm2271_vm2, %v5053_v33  ;;  %8887 = vmatmul.mubr.msk.f32.vlgmr.msra.gmra.mrb[68].mxu0 %vm2271_vm2, %v5055_v11 }
 0x534   : > { %v5125_v42 = vpop.f32.mrb[34].mxu1 }
 0x535   : > { %v8733_v51 = vpop.f32.mrb[35].mxu1 }
 0x538   : > { %v5271_v44 = vpop.f32.mrb[36].mxu1 }
 0x539   : > { %v5198_v47 = vpop.f32.mrb[38].mxu0  ;;  %v7392_v20 = vcombine.low %v5125_v42, %v5271_v44  ;;  %v7393_v52 = vcombine.high %v5125_v42, %v5271_v44  ;;  %v8743_v58 = vpop.f32.mrb[37].mxu1 }
 0x53a   : > { %v8738_v57 = vpop.f32.mrb[39].mxu0 }
 0x53b   : > { %v7400_v45 = vrot.slane %v7392_v20, %v9829_v13  ;;  %v7407_v9 = vrot.slane %v7393_v52, %v9829_v13 }
 0x53d   : > { %v5344_v60 = vpop.f32.mrb[40].mxu0 }
 0x53e   : > { %v7408_v38 = vcombine.low %v5198_v47, %v5344_v60  ;;  %v7409_v14 = vcombine.high %v5198_v47, %v5344_v60  ;;  %v5417_v18 = vpop.f32.mrb[38].mxu1  ;;  %v8748_v25 = vpop.f32.mrb[41].mxu0 }
 0x53f   : > { %v8753_v36 = vpop.f32.mrb[39].mxu1  ;;  %v8082_v25 = vld [vmem:[#allocation7] sm:$0xff] }
 0x540   : > { %v7416_v26 = vrot.slane %v7408_v38, %v9829_v13  ;;  %v7423_v35 = vrot.slane %v7409_v14, %v9829_v13  ;;  %v8083_v36 = vld [vmem:[#allocation7 + $0x8] sm:$0xff] }
 0x542   : > { %v7456_v46 = vcombine.low %v7400_v45, %v7416_v26  ;;  %v7457_v32 = vcombine.high %v7400_v45, %v7416_v26  ;;  %v7472_v22 = vcombine.low %v7407_v9, %v7423_v35  ;;  %v7473_v30 = vcombine.high %v7407_v9, %v7423_v35 }
 0x543   : > { %v8927_v9 = vpack.c.bf16 %v8083_v36, %v8082_v25 }
 0x544   : > { %v11302_v34 = vrot.slane %v7456_v46, %v9851_v28  ;;  %v11305_v54 = vrot.slane %v7472_v22, %v9851_v28  ;;  %v7471_v1 = vrot.slane %v7457_v32, %v9851_v28  ;;  %v7487_v53 = vrot.slane %v7473_v30, %v9851_v28 }
 0x545   : > { %v5490_v49 = vpop.f32.mrb[42].mxu0  ;;  %8928 = vmatprep.subr.bf16.mxu1 %v8927_v9 }
 0x546   : > { %v8758_v17 = vpop.f32.mrb[43].mxu0  ;;  %8930 = vmatpush3.bf16.msra.mxu1 %v8927_v9 }
 0x547   : > { %v5563_v56 = vpop.f32.mrb[40].mxu1 }
 0x548   : > { %v7424_v43 = vcombine.low %v5417_v18, %v5563_v56  ;;  %v7425_v15 = vcombine.high %v5417_v18, %v5563_v56  ;;  %v8763_v59 = vpop.f32.mrb[41].mxu1 }
 0x549   : > { %v5636_v31 = vpop.f32.mrb[44].mxu0 }
 0x54a   : > { %v7440_v55 = vcombine.low %v5490_v49, %v5636_v31  ;;  %v7441_v0 = vcombine.high %v5490_v49, %v5636_v31  ;;  %v8768_v24 = vpop.f32.mrb[45].mxu0  ;;  %v7432_v50 = vrot.slane %v7424_v43, %v9829_v13  ;;  %v7439_v8 = vrot.slane %v7425_v15, %v9829_v13  ;;  %v8084_v43 = vld [vmem:[#allocation7 + $0x10] sm:$0xff]  ;;  %v8085_v15 = vld [vmem:[#allocation7 + $0x18] sm:$0xff] }
 0x54b   : > { %v8931_v31 = vpack.c.bf16 %v8085_v15, %v8084_v43 }
 0x54c   : > { %v7448_v3 = vrot.slane %v7440_v55, %v9829_v13  ;;  %v7455_v41 = vrot.slane %v7441_v0, %v9829_v13 }
 0x54d   : > { %v5782_v10 = vpop.f32.mrb[46].mxu0  ;;  %8932 = vmatprep.subr.bf16.mxu1 %v8931_v31 }
 0x54e   : > { %v7488_v4 = vcombine.low %v7432_v50, %v7448_v3  ;;  %v7489_v16 = vcombine.high %v7432_v50, %v7448_v3  ;;  %v7504_v39 = vcombine.low %v7439_v8, %v7455_v41  ;;  %v7505_v2 = vcombine.high %v7439_v8, %v7455_v41  ;;  %v8778_v37 = vpop.f32.mrb[47].mxu0  ;;  %v8086_v41 = vld [vmem:[#allocation7 + $0x20] sm:$0xff]  ;;  %8934 = vmatpush3.bf16.msra.mxu1 %v8931_v31 }
 0x550   : > { %v11308_v62 = vrot.slane %v7488_v4, %v9851_v28  ;;  %v7503_v7 = vrot.slane %v7489_v16, %v9851_v28  ;;  %v11312_v23 = vrot.slane %v7504_v39, %v9851_v28  ;;  %v7519_v27 = vrot.slane %v7505_v2, %v9851_v28 }
 0x551   : > { %v5709_v48 = vpop.f32.mrb[42].mxu1  ;;  %v5928_v61 = vpop.f32.mrb[48].mxu0 }
 0x552   : > { %v8773_v29 = vpop.f32.mrb[43].mxu1  ;;  %v7544_v40 = vcombine.low %v5782_v10, %v5928_v61  ;;  %v7545_v5 = vcombine.high %v5782_v10, %v5928_v61  ;;  %v8788_v21 = vpop.f32.mrb[49].mxu0  ;;  %v7525_v63 = vcombine.high %v11305_v54, %v11312_v23  ;;  %v7521_v6 = vcombine.high %v11302_v34, %v11308_v62  ;;  %v8087_v10 = vld [vmem:[#allocation7 + $0x28] sm:$0xff] }
 0x553   : > { %v7526_v12 = vcombine.low %v7487_v53, %v7519_v27  ;;  %v7522_v19 = vcombine.low %v7471_v1, %v7503_v7  ;;  %v7527_v11 = vcombine.high %v7487_v53, %v7519_v27  ;;  %v7523_v33 = vcombine.high %v7471_v1, %v7503_v7 }
 0x554   : > { %8004 = vrot.lane.b32.xlu1 %v7525_v63, %s9339_s27  ;;  %7940 = vrot.lane.b32.xlu0 %v7521_v6, %s9340_s20  ;;  %v7524_v51 = vcombine.low %v11305_v54, %v11312_v23  ;;  %v7520_v58 = vcombine.low %v11302_v34, %v11308_v62  ;;  %v7552_v60 = vrot.slane %v7544_v40, %v9829_v13 }
 0x555   : > { %v5855_v42 = vpop.f32.mrb[44].mxu1  ;;  %v6074_v20 = vpop.f32.mrb[50].mxu0  ;;  %v11329_v38 = vrot.slane %v7545_v5, %v9829_v13  ;;  %v8935_v2 = vpack.c.bf16 %v8087_v10, %v8086_v41 }
 0x556   : > { %v7528_v44 = vcombine.low %v5709_v48, %v5855_v42  ;;  %v7529_v47 = vcombine.high %v5709_v48, %v5855_v42  ;;  %v8783_v52 = vpop.f32.mrb[45].mxu1  ;;  %v8798_v57 = vpop.f32.mrb[51].mxu0 }
 0x557   : > { %8936 = vmatprep.subr.bf16.mxu1 %v8935_v2 }
 0x558   : > { %v7536_v14 = vrot.slane %v7528_v44, %v9829_v13  ;;  %v11333_v18 = vrot.slane %v7529_v47, %v9829_v13  ;;  %8020 = vrot.lane.b32.xlu1 %v7526_v12, %s9341_s29  ;;  %7956 = vrot.lane.b32.xlu0 %v7522_v19, %s9342_s5 }
 0x559   : > { %v6001_v45 = vpop.f32.mrb[46].mxu1  ;;  %v6220_v22 = vpop.f32.mrb[52].mxu0  ;;  %8938 = vmatpush3.bf16.msra.mxu1 %v8935_v2 }
 0x55a   : > { %v7592_v26 = vcombine.low %v7536_v14, %v7552_v60  ;;  %v7593_v35 = vcombine.high %v7536_v14, %v7552_v60  ;;  %v7608_v46 = vcombine.low %v11333_v18, %v11329_v38  ;;  %v7609_v32 = vcombine.high %v11333_v18, %v11329_v38  ;;  %v8793_v30 = vpop.f32.mrb[47].mxu1  ;;  %v8808_v17 = vpop.f32.mrb[53].mxu0 }
 0x55b   : > { %v7576_v49 = vcombine.low %v6074_v20, %v6220_v22  ;;  %v7577_v56 = vcombine.high %v6074_v20, %v6220_v22 }
 0x55c   : > { %8036 = vrot.lane.b32.xlu1 %v7527_v11, %s9343_s12  ;;  %7972 = vrot.lane.b32.xlu0 %v7523_v33, %s9344_s24  ;;  %v11348_v37 = vrot.slane %v7592_v26, %v9851_v28  ;;  %v7607_v53 = vrot.slane %v7593_v35, %v9851_v28  ;;  %v7616_v61 = vrot.slane %v7608_v46, %v9851_v28  ;;  %v8088_v11 = vld [vmem:[#allocation7 + $0x30] sm:$0xff]  ;;  %v8089_v33 = vld [vmem:[#allocation7 + $0x38] sm:$0xff] }
 0x55d   : > { %v6147_v59 = vpop.f32.mrb[48].mxu1  ;;  %v6366_v24 = vpop.f32.mrb[54].mxu0  ;;  %v7584_v8 = vrot.slane %v7576_v49, %v9829_v13  ;;  %v7591_v4 = vrot.slane %v7577_v56, %v9829_v13  ;;  %v7623_v42 = vrot.slane %v7609_v32, %v9851_v28 }
 0x55e   : > { %v7560_v55 = vcombine.low %v6001_v45, %v6147_v59  ;;  %v7561_v0 = vcombine.high %v6001_v45, %v6147_v59  ;;  %v8803_v50 = vpop.f32.mrb[49].mxu1  ;;  %v8818_v3 = vpop.f32.mrb[55].mxu0 }
 0x560   : > { %v7568_v16 = vrot.slane %v7560_v55, %v9829_v13  ;;  %v7575_v39 = vrot.slane %v7561_v0, %v9829_v13  ;;  %7988 = vrot.lane.b32.xlu0 %v7524_v51, %s9345_s25  ;;  %v8939_v51 = vpack.c.bf16 %v8089_v33, %v8088_v11 }
 0x561   : > { %v6512_v1 = vpop.f32.mrb[56].mxu0 }
 0x562   : > { %v7624_v54 = vcombine.low %v7568_v16, %v7584_v8  ;;  %v7625_v7 = vcombine.high %v7568_v16, %v7584_v8  ;;  %v7640_v23 = vcombine.low %v7575_v39, %v7591_v4  ;;  %v7641_v27 = vcombine.high %v7575_v39, %v7591_v4  ;;  %v6293_v48 = vpop.f32.mrb[50].mxu1  ;;  %v8828_v21 = vpop.f32.mrb[57].mxu0  ;;  %8940 = vmatprep.subr.bf16.mxu1 %v8939_v51 }
 0x563   : > { %v7680_v29 = vcombine.low %v6366_v24, %v6512_v1  ;;  %v7681_v40 = vcombine.high %v6366_v24, %v6512_v1  ;;  %v8813_v5 = vpop.f32.mrb[51].mxu1  ;;  %8942 = vmatpush3.bf16.msra.mxu1 %v8939_v51 }
 0x564   : > { %v11354_v63 = vrot.slane %v7624_v54, %v9851_v28  ;;  %v7639_v6 = vrot.slane %v7625_v7, %v9851_v28  ;;  %v7648_v12 = vrot.slane %v7640_v23, %v9851_v28  ;;  %v7655_v19 = vrot.slane %v7641_v27, %v9851_v28 }
 0x565   : > { %v7688_v35 = vrot.slane %v7680_v29, %v9829_v13  ;;  %v7695_v46 = vrot.slane %v7681_v40, %v9829_v13 }
 0x566   : > { %v6658_v44 = vpop.f32.mrb[58].mxu0  ;;  %v7660_v47 = vcombine.low %v7616_v61, %v7648_v12  ;;  %v7657_v20 = vcombine.high %v11348_v37, %v11354_v63  ;;  %v7661_v52 = vcombine.high %v7616_v61, %v7648_v12  ;;  %v7658_v57 = vcombine.low %v7607_v53, %v7639_v6 }
 0x567   : > { %v8838_v60 = vpop.f32.mrb[59].mxu0  ;;  %v7662_v38 = vcombine.low %v7623_v42, %v7655_v19  ;;  %v7659_v14 = vcombine.high %v7607_v53, %v7639_v6  ;;  %v7663_v18 = vcombine.high %v7623_v42, %v7655_v19  ;;  %v7656_v25 = vcombine.low %v11348_v37, %v11354_v63 }
 0x568   : > { %7990 = vrot.lane.b32.xlu0 %v7660_v47, %s9345_s25  ;;  %7942 = vrot.lane.b32.xlu1 %v7657_v20, %s9340_s20 }
 0x56a   : > { %v6439_v36 = vpop.f32.mrb[52].mxu1 }
 0x56b   : > { %v7664_v45 = vcombine.low %v6293_v48, %v6439_v36  ;;  %v7665_v9 = vcombine.high %v6293_v48, %v6439_v36  ;;  %v8823_v26 = vpop.f32.mrb[53].mxu1 }
 0x56c   : > { %8006 = vrot.lane.b32.xlu0 %v7661_v52, %s9339_s27  ;;  %7958 = vrot.lane.b32.xlu1 %v7658_v57, %s9342_s5 }
 0x56d   : > { %v7672_v32 = vrot.slane %v7664_v45, %v9829_v13  ;;  %v7679_v22 = vrot.slane %v7665_v9, %v9829_v13 }
 0x56e   : > { %v6585_v30 = vpop.f32.mrb[54].mxu1  ;;  %v6804_v49 = vpop.f32.mrb[60].mxu0 }
 0x56f   : > { %v7728_v56 = vcombine.low %v7672_v32, %v7688_v35  ;;  %v7729_v17 = vcombine.high %v7672_v32, %v7688_v35  ;;  %v7744_v43 = vcombine.low %v7679_v22, %v7695_v46  ;;  %v7745_v15 = vcombine.high %v7679_v22, %v7695_v46  ;;  %v8833_v59 = vpop.f32.mrb[55].mxu1  ;;  %v8848_v31 = vpop.f32.mrb[61].mxu0 }
 0x570   : > { %v7712_v55 = vcombine.low %v6658_v44, %v6804_v49  ;;  %v7713_v0 = vcombine.high %v6658_v44, %v6804_v49  ;;  %8022 = vrot.lane.b32.xlu0 %v7662_v38, %s9341_s29  ;;  %7974 = vrot.lane.b32.xlu1 %v7659_v14, %s9344_s24 }
 0x571   : > { %v11380_v23 = vrot.slane %v7728_v56, %v9851_v28  ;;  %v7743_v27 = vrot.slane %v7729_v17, %v9851_v28  ;;  %v7752_v48 = vrot.slane %v7744_v43, %v9851_v28  ;;  %v11385_v1 = vrot.slane %v7745_v15, %v9851_v28 }
 0x572   : > { %v6731_v24 = vpop.f32.mrb[56].mxu1  ;;  %v7720_v41 = vrot.slane %v7712_v55, %v9829_v13  ;;  %v7727_v10 = vrot.slane %v7713_v0, %v9829_v13 }
 0x573   : > { %v7696_v50 = vcombine.low %v6585_v30, %v6731_v24  ;;  %v7697_v8 = vcombine.high %v6585_v30, %v6731_v24  ;;  %v8843_v3 = vpop.f32.mrb[57].mxu1 }
 0x574   : > { %8038 = vrot.lane.b32.xlu0 %v7663_v18, %s9343_s12 }
 0x575   : > { %v7704_v4 = vrot.slane %v7696_v50, %v9829_v13  ;;  %v7711_v16 = vrot.slane %v7697_v8, %v9829_v13 }
 0x577   : > { %v7760_v39 = vcombine.low %v7704_v4, %v7720_v41  ;;  %v7761_v2 = vcombine.high %v7704_v4, %v7720_v41  ;;  %v7776_v54 = vcombine.low %v7711_v16, %v7727_v10  ;;  %v7777_v7 = vcombine.high %v7711_v16, %v7727_v10 }
 0x579   : > { %v11388_v53 = vrot.slane %v7760_v39, %v9851_v28  ;;  %v7775_v61 = vrot.slane %v7761_v2, %v9851_v28  ;;  %v7784_v29 = vrot.slane %v7776_v54, %v9851_v28  ;;  %v11393_v40 = vrot.slane %v7777_v7, %v9851_v28 }
 0x57b   : > { %v7797_v5 = vcombine.high %v7752_v48, %v7784_v29  ;;  %v7793_v21 = vcombine.high %v11380_v23, %v11388_v53  ;;  %v7798_v6 = vcombine.low %v11385_v1, %v11393_v40  ;;  %v7794_v12 = vcombine.low %v7743_v27, %v7775_v61 }
 0x57c   : > { %v7795_v19 = vcombine.high %v7743_v27, %v7775_v61  ;;  %v7796_v11 = vcombine.low %v7752_v48, %v7784_v29  ;;  %v7799_v33 = vcombine.high %v11385_v1, %v11393_v40  ;;  %v7792_v42 = vcombine.low %v11380_v23, %v11388_v53 }
 0x57d   : > { %8008 = vrot.lane.b32.xlu0 %v7797_v5, %s9339_s27  ;;  %7944 = vrot.lane.b32.xlu1 %v7793_v21, %s9340_s20 }
 0x580   : > { %v6877_v51 = vpop.f32.mrb[58].mxu1  ;;  %v6950_v44 = vpop.f32.mrb[62].mxu0 }
 0x581   : > { %v8853_v47 = vpop.f32.mrb[59].mxu1  ;;  %8024 = vrot.lane.b32.xlu0 %v7798_v6, %s9341_s29  ;;  %7960 = vrot.lane.b32.xlu1 %v7794_v12, %s9342_s5  ;;  %v8858_v20 = vpop.f32.mrb[63].mxu0 }
 0x585   : > { %v7023_v52 = vpop.f32.mrb[60].mxu1  ;;  %v7096_v57 = vpop.f32.mrb[64].mxu0  ;;  %7976 = vrot.lane.b32.xlu1 %v7795_v19, %s9344_s24 }
 0x586   : > { %v7800_v60 = vcombine.low %v6877_v51, %v7023_v52  ;;  %v7801_v38 = vcombine.high %v6877_v51, %v7023_v52  ;;  %v7816_v14 = vcombine.low %v6950_v44, %v7096_v57  ;;  %v7817_v18 = vcombine.high %v6950_v44, %v7096_v57  ;;  %v8863_v36 = vpop.f32.mrb[61].mxu1  ;;  %v8868_v45 = vpop.f32.mrb[65].mxu0 }
 0x588   : > { %v7808_v9 = vrot.slane %v7800_v60, %v9829_v13  ;;  %v7815_v26 = vrot.slane %v7801_v38, %v9829_v13  ;;  %v7824_v35 = vrot.slane %v7816_v14, %v9829_v13  ;;  %v7831_v46 = vrot.slane %v7817_v18, %v9829_v13 }
 0x589   : > { %v7169_v32 = vpop.f32.mrb[62].mxu1  ;;  %v7242_v22 = vpop.f32.mrb[66].mxu0  ;;  %7992 = vrot.lane.b32.xlu1 %v7796_v11, %s9345_s25 }
 0x58a   : > { %v7864_v30 = vcombine.low %v7808_v9, %v7824_v35  ;;  %v7865_v49 = vcombine.high %v7808_v9, %v7824_v35  ;;  %v7880_v56 = vcombine.low %v7815_v26, %v7831_v46  ;;  %v7881_v17 = vcombine.high %v7815_v26, %v7831_v46  ;;  %v8873_v43 = vpop.f32.mrb[63].mxu1  ;;  %v8878_v15 = vpop.f32.mrb[67].mxu0 }
 0x58c   : > { %v11418_v27 = vrot.slane %v7864_v30, %v9851_v28  ;;  %v7879_v48 = vrot.slane %v7865_v49, %v9851_v28  ;;  %v7888_v61 = vrot.slane %v7880_v56, %v9851_v28  ;;  %v7895_v6 = vrot.slane %v7881_v17, %v9851_v28 }
 0x58d   : > { %v7315_v59 = vpop.f32.mrb[64].mxu1  ;;  %v7388_v31 = vpop.f32.mrb[68].mxu0 }
 0x58e   : > { %v7832_v55 = vcombine.low %v7169_v32, %v7315_v59  ;;  %v7833_v0 = vcombine.high %v7169_v32, %v7315_v59  ;;  %v7848_v24 = vcombine.low %v7242_v22, %v7388_v31  ;;  %v7849_v50 = vcombine.high %v7242_v22, %v7388_v31  ;;  %v8883_v8 = vpop.f32.mrb[65].mxu1  ;;  %v8888_v3 = vpop.f32.mrb[69].mxu0 }
 0x590   : > { %v7840_v41 = vrot.slane %v7832_v55, %v9829_v13  ;;  %v7847_v10 = vrot.slane %v7833_v0, %v9829_v13  ;;  %v7856_v4 = vrot.slane %v7848_v24, %v9829_v13  ;;  %v7863_v16 = vrot.slane %v7849_v50, %v9829_v13 }
 0x592   : > { %v7896_v39 = vcombine.low %v7840_v41, %v7856_v4  ;;  %v7897_v2 = vcombine.high %v7840_v41, %v7856_v4  ;;  %v7912_v54 = vcombine.low %v7847_v10, %v7863_v16  ;;  %v7913_v7 = vcombine.high %v7847_v10, %v7863_v16 }
 0x594   : > { %v11423_v29 = vrot.slane %v7896_v39, %v9851_v28  ;;  %v7911_v5 = vrot.slane %v7897_v2, %v9851_v28  ;;  %v7920_v21 = vrot.slane %v7912_v54, %v9851_v28  ;;  %v7927_v13 = vrot.slane %v7913_v7, %v9851_v28 }
 0x596   : > { %v7932_v12 = vcombine.low %v7888_v61, %v7920_v21  ;;  %v7929_v19 = vcombine.high %v11418_v27, %v11423_v29  ;;  %v7933_v11 = vcombine.high %v7888_v61, %v7920_v21  ;;  %v7930_v51 = vcombine.low %v7879_v48, %v7911_v5 }
 0x597   : > { %v7934_v44 = vcombine.low %v7895_v6, %v7927_v13  ;;  %v7931_v47 = vcombine.high %v7879_v48, %v7911_v5  ;;  %v7935_v20 = vcombine.high %v7895_v6, %v7927_v13  ;;  %v7928_v52 = vcombine.low %v11418_v27, %v11423_v29 }
 0x598   : > { %7994 = vrot.lane.b32.xlu1 %v7932_v12, %s9345_s25  ;;  %7946 = vrot.lane.b32.xlu0 %v7929_v19, %s9340_s20  ;;  %v8417_v12 = vld [vmem:[%s11548_s3] ss:$0 sm:$0xff] }
 0x59c   : > { %8010 = vrot.lane.b32.xlu1 %v7933_v11, %s9339_s27  ;;  %7962 = vrot.lane.b32.xlu0 %v7930_v51, %s9342_s5  ;;  %s9346_s27 = smov [#allocation8]  }
 0x5a0   : > { %8026 = vrot.lane.b32.xlu1 %v7934_v44, %s9341_s29  ;;  %7978 = vrot.lane.b32.xlu0 %v7931_v47, %s9344_s24  ;;  %s9252_s29 = sshll.u32 %s9346_s27, 4  ;;  %s9253_s29 = int_to_ptr.vmem [resolvable:$false] %s9252_s29 }
 0x5a1   : > { %s9254_s5 = scalar_lea.vmem %s9253_s29, 1024  ;;  %p9255_p5 = scmp.lt.s32.totalorder %s11493_s8, %s9253_s29 }
 0x5a2   : > { %p9256_p9 = scmp.lt.s32.totalorder %s9254_s5, %s9248_s19 }
 0x5a4   : > { %8042 = vrot.lane.b32.xlu1 %v7935_v20, %s9343_s12  ;;  %8040 = vrot.lane.b32.xlu0 %v7799_v33, %s9343_s12  ;;  %p9257_p12 = por %p9256_p9, %p9255_p5 }
 0x5a6   : > { %p9258_p2 = pnand %p9257_p12, %p9251_p3 }
 0x5c6   : > { %v7941_v28 = vpop.permute.xlu0 %7940  ;;  %v8005_v57 = vpop.permute.xlu1 %8004 }
 0x5c7   : > { %v8048_v18 = vsel %vm2271_vm2, %v7520_v58, %v7941_v28 }
 0x5ca   : > { %v7957_v60 = vpop.permute.xlu0 %7956  ;;  %v8021_v14 = vpop.permute.xlu1 %8020 }
 0x5cb   : > { %v8053_v36 = vsel %vm8052_vm3, %v8048_v18, %v7957_v60 }
 0x5ce   : > { %v7973_v38 = vpop.permute.xlu0 %7972  ;;  %v8037_v9 = vpop.permute.xlu1 %8036 }
 0x5cf   : > { %v8058_v45 = vsel %vm8057_vm4, %v8053_v36, %v7973_v38 }
 0x5d2   : > { %v7989_v1 = vpop.permute.xlu0 %7988 }
 0x5d3   : > { %v8063_v40 = vsel %vm8062_vm5, %v8058_v45, %v7989_v1 }
 0x5d4   : > { %v8068_v33 = vsel %vm8067_vm6, %v8063_v40, %v8005_v57 }
 0x5d5   : > { %v8073_v26 = vsel %vm8072_vm7, %v8068_v33, %v8021_v14 }
 0x5d6   : > { %v8078_v34 = vsel %vm8077_vm8, %v8073_v26, %v8037_v9 }
 0x5d7   : > { %8905 = vmatprep.mubr.msk.f32.mxu1 %vm265_vm0, %v8078_v34 }
 0x5da   : > { %v7991_v62 = vpop.permute.xlu0 %7990  ;;  %v7943_v58 = vpop.permute.xlu1 %7942 }
 0x5db   : > { %v8049_v32 = vsel %vm2271_vm2, %v7656_v25, %v7943_v58 }
 0x5de   : > { %v8007_v35 = vpop.permute.xlu0 %8006  ;;  %v7959_v46 = vpop.permute.xlu1 %7958 }
 0x5df   : > { %v8054_v22 = vsel %vm8052_vm3, %v8049_v32, %v7959_v46 }
 0x5e2   : > { %v8023_v30 = vpop.permute.xlu0 %8022  ;;  %v7975_v49 = vpop.permute.xlu1 %7974 }
 0x5e3   : > { %v8059_v56 = vsel %vm8057_vm4, %v8054_v22, %v7975_v49 }
 0x5e4   : > { %v8064_v17 = vsel %vm8062_vm5, %v8059_v56, %v7991_v62 }
 0x5e5   : > { %v8069_v43 = vsel %vm8067_vm6, %v8064_v17, %v8007_v35 }
 0x5e6   : > { %v8039_v15 = vpop.permute.xlu0 %8038  ;;  %v8074_v59 = vsel %vm8072_vm7, %v8069_v43, %v8023_v30 }
 0x5e7   : > { %v8079_v31 = vsel %vm8077_vm8, %v8074_v59, %v8039_v15 }
 0x5e8   : > { %8906 = vmatmul.mubr.msk.f32.vlgmr.msra.gmra.mrb[66].mxu1 %vm265_vm0, %v8079_v31 }
 0x5ef   : > { %v7945_v37 = vpop.permute.xlu1 %7944  ;;  %v8009_v25 = vpop.permute.xlu0 %8008 }
 0x5f0   : > { %v8050_v0 = vsel %vm2271_vm2, %v7792_v42, %v7945_v37 }
 0x5f3   : > { %v7961_v63 = vpop.permute.xlu1 %7960  ;;  %v8025_v41 = vpop.permute.xlu0 %8024 }
 0x5f4   : > { %v8055_v24 = vsel %vm8052_vm3, %v8050_v0, %v7961_v63 }
 0x5f7   : > { %v7977_v55 = vpop.permute.xlu1 %7976 }
 0x5f8   : > { %v8060_v50 = vsel %vm8057_vm4, %v8055_v24, %v7977_v55 }
 0x5fb   : > { %v7993_v8 = vpop.permute.xlu1 %7992 }
 0x5fc   : > { %v8065_v3 = vsel %vm8062_vm5, %v8060_v50, %v7993_v8 }
 0x5fd   : > { %v8070_v10 = vsel %vm8067_vm6, %v8065_v3, %v8009_v25 }
 0x5fe   : > { %v8075_v4 = vsel %vm8072_vm7, %v8070_v10, %v8025_v41 }
 0x60a   : > { %v7995_v16 = vpop.permute.xlu1 %7994  ;;  %v7947_v39 = vpop.permute.xlu0 %7946 }
 0x60b   : > { %v8051_v23 = vsel %vm2271_vm2, %v7928_v52, %v7947_v39 }
 0x60e   : > { %v8011_v2 = vpop.permute.xlu1 %8010  ;;  %v7963_v54 = vpop.permute.xlu0 %7962 }
 0x60f   : > { %v8056_v53 = vsel %vm8052_vm3, %v8051_v23, %v7963_v54 }
 0x612   : > { %v8027_v42 = vpop.permute.xlu1 %8026  ;;  %v7979_v7 = vpop.permute.xlu0 %7978 }
 0x613   : > { %v8061_v27 = vsel %vm8057_vm4, %v8056_v53, %v7979_v7 }
 0x614   : > { %v8066_v48 = vsel %vm8062_vm5, %v8061_v27, %v7995_v16 }
 0x615   : > { %v8071_v61 = vsel %vm8067_vm6, %v8066_v48, %v8011_v2 }
 0x616   : > { %v8043_v29 = vpop.permute.xlu1 %8042  ;;  %v8076_v5 = vsel %vm8072_vm7, %v8071_v61, %v8027_v42  ;;  %v8041_v21 = vpop.permute.xlu0 %8040 }
 0x617   : > { %v8081_v13 = vsel %vm8077_vm8, %v8076_v5, %v8043_v29  ;;  %v8080_v6 = vsel %vm8077_vm8, %v8075_v4, %v8041_v21 }
 0x618   : > { %8908 = vmatprep.mubr.msk.f32.mxu1 %vm265_vm0, %v8080_v6 }
 0x619   : > { %8909 = vmatmul.mubr.msk.f32.gmra.mrb[68].mxu1 %vm265_vm0, %v8081_v13 }
 0x6bb   : > { %v8907_v19 = vpop.f32.mrb[66].mxu1 }
 0x6bc   : > { %v8181_v11 = vadd.f32 %v8907_v19, %v8417_v12  ;;  %v8175_v51 = vpop.f32.mrb[67].mxu1 }
 0x6bd   : > { %v8176_v44 = vadd.f32 %v8417_v12, %v8175_v51 }
 0x6be   : > { %8195 = vst.msk [vmem:[%s244_s7 + $0x8] sm:$0xff] %vm265_vm0, %v8181_v11 }
 0x6bf   : > { %8194 = vst.msk [vmem:[%s244_s7] sm:$0xff] %vm265_vm0, %v8176_v44 }
 0x6ec   : > { %v8910_v47 = vpop.f32.mrb[68].mxu1 }
 0x6ed   : > { %v8191_v20 = vadd.f32 %v8910_v47, %v8417_v12  ;;  %v8185_v52 = vpop.f32.mrb[69].mxu1 }
 0x6ee   : > { %v8186_v28 = vadd.f32 %v8417_v12, %v8185_v52 }
 0x6ef   : > { %8197 = vst.msk [vmem:[%s244_s7 + $0x18] sm:$0xff] %vm265_vm0, %v8191_v20 }
 0x6f0   : > { %8196 = vst.msk [vmem:[%s244_s7 + $0x10] sm:$0xff] %vm265_vm0, %v8186_v28 }
 0x6f1   : > { %9261 = shalt.err (!%p9258_p2)
}
 0x6f2   : > { %s9262_s12 = scalar_lea.hbm %s11498_s13, 512  ;;  %s9266_s21 = scalar_lea.hbm %s11549_s4, 1024 }
 0x6f3   : > { %p9263_p13 = scmp.ne.s32.totalorder %s11498_s13, %s9262_s12  ;;  %p9267_p4 = scmp.lt.u32.totalorder %s11498_s13, %s11549_s4 }
 0x6f4   : > { %p9268_p7 = scmp.lt.u32.totalorder %s9266_s21, %s9262_s12  ;;  %p9270_p11 = scmp.lt.u32.totalorder %s9262_s12, %s11498_s13 }
 0x6f5   : > { %p9264_p6 = pnand %p9263_p13, %p11663_p0 }
 0x6f6   : > { %p9269_p8 = por %p9268_p7, %p9267_p4 }
 0x6f7   : > { %p9265_p10 = pneg %p9264_p6 }
 0x6f8   : > { %p9271_p1 = por %p9270_p11, %p9269_p8 }
 0x6fa   : > { %p9272_p3 = pnand %p9271_p1, %p9265_p10 }
 0x6fc   : > { %9275 = shalt.err (!%p9272_p3)
}
 0x6fd   : > { %s9347_s30 = smov 128  }
 0x6fe   : > { %8953 = dma.vmem_to_hbm [thread:$0]  (%p11663_p0), %s11493_s8, 512, %s11498_s13, %s8199_s28, %s9347_s30, %s9347_s30, %s9340_s20  }
 0x6ff PF: > { %s8227_s6 = sand.u32 1, %s9306_s15   ;;  %p11664_p5 = scmp.ne.s32.totalorder %s11587_s22, 0 }
 0x700   : > { %p11665_p9 = scmp.ge.s32.totalorder %s9318_s18, 2  ;;  %s8228_s9 = scalar_lea.sflag [#allocation4], %s8227_s6 }
 0x702   : > { %p8967_p12 = pnand %p11665_p9, %p11664_p5 }
 0x704   : > { %9301 = dma.done.wait (!%p8967_p12), %s8228_s9, 512  }
 0x705   : > { %9303 = vsyncadd (!%p8967_p12), %s8228_s9, 4294966784  ;;  %p18_p2 = scmp.ge.s32.totalorder %s9486_s11, 4   ;;  %s11666_s15 = smov %s9310_s16 }
 0x706   : > { %s11667_s16 = smov %s9314_s17  ;;  %s11668_s17 = smov %s9495_s14 }
 0x707   : > { %s11669_s18 = smov %s9486_s11  ;;  %20 = sbr.rel (!%p18_p2) target bundleno = 6 (0x6), region = 89 }
 0x70e   :  { %8233 = vsyncpa [#allocation3], 1 }
 0x70f   :  { %8235 = vsyncpa [#allocation3 + $0x1], 1 }
 0x710   :  { %8236 = vsyncpa [#allocation6], 1 }
 0x711   :  { %8237 = vsyncpa [#allocation4], 1 }
 0x712   :  { %8239 = vsyncpa [#allocation4 + $0x1], 1 }

</bundles_post_ra>
